<compile_context>
chip_gen: v6e
topology: v6e:2x2x1
jax: 0.10.0
libtpu: 0.0.40
codegen_flags: <defaults>
</compile_context>

<pallas_src>
import functools

import numpy as np

import jax
import jax.numpy as jnp
from jax.experimental import pallas as pl
from jax.experimental.pallas import tpu as pltpu


# ---------------------------------------------------------------------------
# Fused kernel: one ConvLSTM step + decoder_D + sigmoid, channel-major layout.
# ---------------------------------------------------------------------------
def _encoder_step_kernel(x_ref, h0_ref, c0_ref, mask_ref, wxt_ref, wht_ref,
                         bg_ref, wd_ref, bd_ref,
                         dec_ref, hout_ref, cout_ref,
                         h_scr, c_scr, *, width):
    t = pl.program_id(0)

    # Recurrent state lives in VMEM scratch across the (sequential) time grid.
    @pl.when(t == 0)
    def _init():
        h_scr[...] = h0_ref[...]
        c_scr[...] = c0_ref[...]

    x_t = x_ref[0]                               # (NCp, M)  f32
    h_prev = h_scr[...]                          # (NF,  M)  f32
    c_prev = c_scr[...]                          # (NF,  M)  f32
    nf, m_len = h_prev.shape

    # --- im2col via XLU lane rolls + static boundary masks (zero padding) ---
    #     tap (dr, dc): column m needs the value at flat index m + dr*W + dc.
    def tap_stack(v):
        rows, tap = [], 0
        for dr in (-1, 0, 1):
            for dc in (-1, 0, 1):
                s = dr * width + dc
                shifted = v if s == 0 else pltpu.roll(
                    v, shift=(-s) % m_len, axis=1)
                rows.append(shifted * mask_ref[tap])        # (C, M) * (1, M)
                tap += 1
        return jnp.concatenate(rows, axis=0)                # (9*C, M)

    patches_x = tap_stack(x_t).astype(jnp.bfloat16)         # (9*NCp, M)
    patches_h = tap_stack(h_prev).astype(jnp.bfloat16)      # (9*NF,  M)

    # --- gate pre-activations: two dense MXU matmuls, f32 accumulation ------
    gates = (jnp.dot(wxt_ref[...], patches_x, preferred_element_type=jnp.float32)
             + jnp.dot(wht_ref[...], patches_h, preferred_element_type=jnp.float32)
             + bg_ref[...])                                 # (4*NF, M)

    i_g = jax.nn.sigmoid(gates[0 * nf:1 * nf, :])
    f_g = jax.nn.sigmoid(gates[1 * nf:2 * nf, :])
    o_g = jax.nn.sigmoid(gates[2 * nf:3 * nf, :])
    g_g = jnp.tanh(gates[3 * nf:4 * nf, :])

    c_new = f_g * c_prev + i_g * g_g
    h_new = o_g * jnp.tanh(c_new)

    h_scr[...] = h_new
    c_scr[...] = c_new
    hout_ref[...] = h_new
    cout_ref[...] = c_new

    # --- decoder_D (1x1 conv nf->nc) + sigmoid; (NC, M) store is lane-dense -
    dec = (jnp.dot(wd_ref[...], h_new.astype(jnp.bfloat16),
                   preferred_element_type=jnp.float32) + bd_ref[...])
    dec_ref[0] = jax.nn.sigmoid(dec)                        # (NC, M)


# ---------------------------------------------------------------------------
# Wrappers
# ---------------------------------------------------------------------------
def _tap_masks(batch, height, width):
    """(9, 1, B*H*W) f32 validity masks of the 3x3 taps (zero padding)."""
    i = np.arange(height * width) // width
    j = np.arange(height * width) % width
    rows = []
    for dr in (-1, 0, 1):
        for dc in (-1, 0, 1):
            ok = ((i + dr >= 0) & (i + dr < height) &
                  (j + dc >= 0) & (j + dc < width))
            rows.append(np.tile(ok.astype(np.float32), batch))
    return np.stack(rows)[:, None, :]


def _encoder_rnn_pallas(x_cm, h0, c0, params, batch, height, width):
    """x_cm: (T, NC, M) channel-major frames; h0/c0: (NF, M)."""
    seq_len, nc, m_len = x_cm.shape
    nf = h0.shape[0]

    # Pad the tiny x channel dim up to a sublane multiple so the in-kernel
    # im2col concat stays (8,128)-aligned (padded channels have zero weight).
    ncp = -(-nc // 8) * 8
    x_p = jnp.pad(x_cm, ((0, 0), (0, ncp - nc), (0, 0)))
    w_xt = jnp.pad(params["w_xt"].reshape(4 * nf, 9, nc),
                   ((0, 0), (0, 0), (0, ncp - nc))).reshape(4 * nf, 9 * ncp)
    masks = jnp.asarray(_tap_masks(batch, height, width))

    kernel = functools.partial(_encoder_step_kernel, width=width)
    dec_seq, h_out, c_out = pl.pallas_call(
        kernel,
        out_shape=(
            jax.ShapeDtypeStruct((seq_len, nc, m_len), jnp.float32),
            jax.ShapeDtypeStruct((nf, m_len), jnp.float32),
            jax.ShapeDtypeStruct((nf, m_len), jnp.float32),
        ),
        grid_spec=pltpu.PrefetchScalarGridSpec(
            num_scalar_prefetch=0,
            grid=(seq_len,),
            in_specs=[
                pl.BlockSpec((1, ncp, m_len), lambda t: (t, 0, 0)),    # x_t
                pl.BlockSpec((nf, m_len), lambda t: (0, 0)),           # h0
                pl.BlockSpec((nf, m_len), lambda t: (0, 0)),           # c0
                pl.BlockSpec((9, 1, m_len), lambda t: (0, 0, 0)),      # masks
                pl.BlockSpec((4 * nf, 9 * ncp), lambda t: (0, 0)),     # w_xt
                pl.BlockSpec((4 * nf, 9 * nf), lambda t: (0, 0)),      # w_ht
                pl.BlockSpec((4 * nf, 1), lambda t: (0, 0)),           # b_gates
                pl.BlockSpec((nc, nf), lambda t: (0, 0)),              # w_dec
                pl.BlockSpec((nc, 1), lambda t: (0, 0)),               # b_dec
            ],
            out_specs=[
                pl.BlockSpec((1, nc, m_len), lambda t: (t, 0, 0)),     # frames
                pl.BlockSpec((nf, m_len), lambda t: (0, 0)),           # h_T
                pl.BlockSpec((nf, m_len), lambda t: (0, 0)),           # c_T
            ],
            scratch_shapes=[
                pltpu.VMEM((nf, m_len), jnp.float32),                  # h state
                pltpu.VMEM((nf, m_len), jnp.float32),                  # c state
            ],
        ),
        compiler_params=pltpu.CompilerParams(
            dimension_semantics=("arbitrary",)),    # sequential recurrence in T
    )(x_p, h0, c0, masks, w_xt, params["w_ht"],
      params["b_gates"], params["w_dec"], params["b_dec"])
    return dec_seq, h_out, c_out


@jax.jit
def encoder_rnn_forward_seq(x_seq_nchw, params, h0, c0):
    """Runs T EncoderRNN.forward steps fused inside one pallas_call.

    x_seq_nchw: (T, B, NC, H, W). Returns ((T, B, NC, H, W) frames, (h, c))
    where the carried state is channel-major (NF, B*H*W).
    """
    seq_len, batch, nc, height, width = x_seq_nchw.shape
    m_len = batch * height * width
    x_cm = jnp.transpose(x_seq_nchw, (0, 2, 1, 3, 4)).reshape(seq_len, nc, m_len)
    dec_seq, h_out, c_out = _encoder_rnn_pallas(
        x_cm.astype(jnp.float32), h0, c0, params, batch, height, width)
    frames = dec_seq.reshape(seq_len, nc, batch, height, width)
    frames = jnp.transpose(frames, (0, 2, 1, 3, 4))
    return frames, (h_out, c_out)


@functools.partial(jax.jit, static_argnames=("first_timestep",))
def encoder_rnn_forward(x_nchw, params, state=None, first_timestep=False):
    """EncoderRNN.forward: one frame -> sigmoid(decoder_D(h_t)), state carried."""
    batch, _, height, width = x_nchw.shape
    nf = params["w_dec"].shape[1]
    m_len = batch * height * width
    if first_timestep or state is None:
        h0 = jnp.zeros((nf, m_len), jnp.float32)
        c0 = jnp.zeros((nf, m_len), jnp.float32)
    else:
        h0, c0 = state
    frames, new_state = encoder_rnn_forward_seq(x_nchw[None], params, h0, c0)
    return frames[0], new_state


def init_params(key, nc=3, nf=64):
    """Single-layer 3x3 ConvLSTM gate conv + decoder_D (1x1, nf->nc)."""
    k1, k2, k3, k4, k5 = jax.random.split(key, 5)
    w_xt = (0.05 * jax.random.normal(k1, (4 * nf, 9 * nc), jnp.float32)
            ).astype(jnp.bfloat16)
    w_ht = (0.05 * jax.random.normal(k2, (4 * nf, 9 * nf), jnp.float32)
            ).astype(jnp.bfloat16)
    b_gates = 0.05 * jax.random.normal(k3, (4 * nf, 1), jnp.float32)
    w_dec = (0.05 * jax.random.normal(k4, (nc, nf), jnp.float32)
             ).astype(jnp.bfloat16)
    b_dec = 0.05 * jax.random.normal(k5, (nc, 1), jnp.float32)
    return {"w_xt": w_xt, "w_ht": w_ht, "b_gates": b_gates,
            "w_dec": w_dec, "b_dec": b_dec}


def _reference_forward_seq(x_seq_nchw, params, h_nhwc, c_nhwc):
    """Pure-JAX f32 reference (no Pallas) used for correctness checking."""
    seq_len, batch, nc, height, width = x_seq_nchw.shape
    nf = h_nhwc.shape[-1]
    w_x = params["w_xt"].astype(jnp.float32).T      # (9*NC, 4*NF)
    w_h = params["w_ht"].astype(jnp.float32).T      # (9*NF, 4*NF)
    b_g = params["b_gates"][:, 0]
    w_d = params["w_dec"].astype(jnp.float32)       # (NC, NF)
    b_d = params["b_dec"][:, 0]
    h, c = h_nhwc, c_nhwc
    frames = []
    for t in range(seq_len):
        x = jnp.transpose(x_seq_nchw[t], (0, 2, 3, 1))           # NHWC
        xp = jnp.pad(x, ((0, 0), (1, 1), (1, 1), (0, 0)))
        hp = jnp.pad(h, ((0, 0), (1, 1), (1, 1), (0, 0)))
        gates = jnp.broadcast_to(b_g, (batch, height, width, 4 * nf))
        for k in range(9):
            kh, kw = k // 3, k % 3
            gates = gates + jnp.einsum(
                "bhwc,cg->bhwg",
                xp[:, kh:kh + height, kw:kw + width, :], w_x[k * nc:(k + 1) * nc])
            gates = gates + jnp.einsum(
                "bhwc,cg->bhwg",
                hp[:, kh:kh + height, kw:kw + width, :], w_h[k * nf:(k + 1) * nf])
        i_g = jax.nn.sigmoid(gates[..., 0 * nf:1 * nf])
        f_g = jax.nn.sigmoid(gates[..., 1 * nf:2 * nf])
        o_g = jax.nn.sigmoid(gates[..., 2 * nf:3 * nf])
        g_g = jnp.tanh(gates[..., 3 * nf:4 * nf])
        c = f_g * c + i_g * g_g
        h = o_g * jnp.tanh(c)
        dec = jax.nn.sigmoid(jnp.einsum("bhwf,cf->bchw", h, w_d)
                             + b_d[None, :, None, None])
        frames.append(dec)
    return jnp.stack(frames), h, c


if __name__ == "__main__":
    # TODO(synk): `convcell` is an injected dependency of EncoderRNN; realized
    # here as a single-layer 3x3 ConvLSTM cell (gate order i, f, o, g).
    key = jax.random.PRNGKey(0)
    kx, kp = jax.random.split(key)

    seq_len, batch, nc, height, width, nf = 4, 2, 3, 8, 8, 64   # M = 128
    x_seq = jax.random.normal(
        kx, (seq_len, batch, nc, height, width), jnp.float32)
    params = init_params(kp, nc=nc, nf=nf)

    # Single-frame API, mirroring EncoderRNN.forward(input, first_timestep).
    out0, state = encoder_rnn_forward(x_seq[0], params, None, first_timestep=True)
    out1, state = encoder_rnn_forward(x_seq[1], params, state, first_timestep=False)

    # Whole sequence fused into a single pallas_call (state never leaves VMEM).
    m_len = batch * height * width
    zeros = jnp.zeros((nf, m_len), jnp.float32)
    out_seq, (h_t, c_t) = encoder_rnn_forward_seq(x_seq, params, zeros, zeros)
    jax.block_until_ready((out0, out1, out_seq, h_t, c_t))

    # Pure-JAX reference check (kernel matmul operands are bf16 -> loose tol).
    ref_frames, ref_h, _ = _reference_forward_seq(
        x_seq, params,
        jnp.zeros((batch, height, width, nf), jnp.float32),
        jnp.zeros((batch, height, width, nf), jnp.float32))
    ref_h_cm = ref_h.reshape(m_len, nf).T

    tol = 2e-2
    assert out0.shape == (batch, nc, height, width)
    assert float(jnp.max(jnp.abs(out0 - ref_frames[0]))) < tol
    assert float(jnp.max(jnp.abs(out1 - ref_frames[1]))) < tol
    assert float(jnp.max(jnp.abs(out_seq - ref_frames))) < tol
    assert float(jnp.max(jnp.abs(h_t - ref_h_cm))) < tol
    assert bool(jnp.all((out_seq >= 0.0) & (out_seq <= 1.0)))
    print("KERNEL_OK")
</pallas_src>

<mosaic_0001>
module attributes {stable_mosaic.version = 11 : i64} {
  func.func @_encoder_step_kernel(%arg0: i32, %arg1: memref<1x8x128xf32, #tpu.memory_space<vmem>>, %arg2: memref<64x128xf32, #tpu.memory_space<vmem>>, %arg3: memref<64x128xf32, #tpu.memory_space<vmem>>, %arg4: memref<9x1x128xf32, #tpu.memory_space<vmem>>, %arg5: memref<256x72xbf16, #tpu.memory_space<vmem>>, %arg6: memref<256x576xbf16, #tpu.memory_space<vmem>>, %arg7: memref<256x1xf32, #tpu.memory_space<vmem>>, %arg8: memref<3x64xbf16, #tpu.memory_space<vmem>>, %arg9: memref<3x1xf32, #tpu.memory_space<vmem>>, %arg10: memref<1x3x128xf32, #tpu.memory_space<vmem>>, %arg11: memref<64x128xf32, #tpu.memory_space<vmem>>, %arg12: memref<64x128xf32, #tpu.memory_space<vmem>>, %arg13: memref<64x128xf32, #tpu.memory_space<vmem>>, %arg14: memref<64x128xf32, #tpu.memory_space<vmem>>) attributes {dimension_semantics = [#tpu.dimension_semantics<arbitrary>], iteration_bounds = array<i64: 1>, scalar_prefetch = 0 : i64, scratch_operands = 2 : i64, tpu.core_type = #tpu.core_type<tc>, window_params = [{transform_indices = @transform_0, window_bounds = array<i64: 1, 8, 128>}, {pipeline_mode = #tpu.pipeline_mode<synchronous>, transform_indices = @transform_1, window_bounds = array<i64: 64, 128>}, {pipeline_mode = #tpu.pipeline_mode<synchronous>, transform_indices = @transform_2, window_bounds = array<i64: 64, 128>}, {pipeline_mode = #tpu.pipeline_mode<synchronous>, transform_indices = @transform_3, window_bounds = array<i64: 9, 1, 128>}, {pipeline_mode = #tpu.pipeline_mode<synchronous>, transform_indices = @transform_4, window_bounds = array<i64: 256, 72>}, {pipeline_mode = #tpu.pipeline_mode<synchronous>, transform_indices = @transform_5, window_bounds = array<i64: 256, 576>}, {pipeline_mode = #tpu.pipeline_mode<synchronous>, transform_indices = @transform_6, window_bounds = array<i64: 256, 1>}, {pipeline_mode = #tpu.pipeline_mode<synchronous>, transform_indices = @transform_7, window_bounds = array<i64: 3, 64>}, {pipeline_mode = #tpu.pipeline_mode<synchronous>, transform_indices = @transform_8, window_bounds = array<i64: 3, 1>}, {transform_indices = @transform_9, window_bounds = array<i64: 1, 3, 128>}, {pipeline_mode = #tpu.pipeline_mode<synchronous>, transform_indices = @transform_10, window_bounds = array<i64: 64, 128>}, {pipeline_mode = #tpu.pipeline_mode<synchronous>, transform_indices = @transform_11, window_bounds = array<i64: 64, 128>}]} {
    %c0_i32 = arith.constant 0 : i32
    %0 = arith.cmpi eq, %arg0, %c0_i32 : i32
    %1 = arith.extui %0 : i1 to i32
    %c0_i32_0 = arith.constant 0 : i32
    %2 = arith.cmpi ne, %1, %c0_i32_0 : i32
    scf.if %2 {
      %c0_88 = arith.constant 0 : index
      %c0_89 = arith.constant 0 : index
      %150 = vector.load %arg2[%c0_88, %c0_89] : memref<64x128xf32, #tpu.memory_space<vmem>>, vector<64x128xf32>
      %c0_90 = arith.constant 0 : index
      %c0_91 = arith.constant 0 : index
      %151 = vector.load %arg13[%c0_90, %c0_91] : memref<64x128xf32, #tpu.memory_space<vmem>>, vector<64x128xf32>
      tpu.vector_store %arg13[%c0_90, %c0_91], %150 {strides = array<i32>} : memref<64x128xf32, #tpu.memory_space<vmem>>, vector<64x128xf32>,
      %c0_92 = arith.constant 0 : index
      %c0_93 = arith.constant 0 : index
      %152 = vector.load %arg3[%c0_92, %c0_93] : memref<64x128xf32, #tpu.memory_space<vmem>>, vector<64x128xf32>
      %c0_94 = arith.constant 0 : index
      %c0_95 = arith.constant 0 : index
      %153 = vector.load %arg14[%c0_94, %c0_95] : memref<64x128xf32, #tpu.memory_space<vmem>>, vector<64x128xf32>
      tpu.vector_store %arg14[%c0_94, %c0_95], %152 {strides = array<i32>} : memref<64x128xf32, #tpu.memory_space<vmem>>, vector<64x128xf32>,
    } else {
    }
    %c0 = arith.constant 0 : index
    %c0_1 = arith.constant 0 : index
    %c0_2 = arith.constant 0 : index
    %3 = vector.load %arg1[%c0, %c0_1, %c0_2] : memref<1x8x128xf32, #tpu.memory_space<vmem>>, vector<1x8x128xf32>
    %4 = vector.shape_cast %3 : vector<1x8x128xf32> to vector<8x128xf32>
    %c0_3 = arith.constant 0 : index
    %c0_4 = arith.constant 0 : index
    %5 = vector.load %arg13[%c0_3, %c0_4] : memref<64x128xf32, #tpu.memory_space<vmem>>, vector<64x128xf32>
    %c0_5 = arith.constant 0 : index
    %c0_6 = arith.constant 0 : index
    %6 = vector.load %arg14[%c0_5, %c0_6] : memref<64x128xf32, #tpu.memory_space<vmem>>, vector<64x128xf32>
    %c9_i32 = arith.constant 9 : i32
    %7 = tpu.dynamic_rotate %4 by %c9_i32 dim 1 : vector<8x128xf32>, i32 -> vector<8x128xf32>
    %c0_7 = arith.constant 0 : index
    %c0_8 = arith.constant 0 : index
    %c0_9 = arith.constant 0 : index
    %8 = vector.load %arg4[%c0_7, %c0_8, %c0_9] : memref<9x1x128xf32, #tpu.memory_space<vmem>>, vector<1x1x128xf32>
    %9 = vector.shape_cast %8 : vector<1x1x128xf32> to vector<1x128xf32>
    %10 = vector.broadcast %9 : vector<1x128xf32> to vector<8x128xf32>
    %11 = arith.mulf %7, %10 : vector<8x128xf32>
    %c8_i32 = arith.constant 8 : i32
    %12 = tpu.dynamic_rotate %4 by %c8_i32 dim 1 : vector<8x128xf32>, i32 -> vector<8x128xf32>
    %c1 = arith.constant 1 : index
    %c0_10 = arith.constant 0 : index
    %c0_11 = arith.constant 0 : index
    %13 = vector.load %arg4[%c1, %c0_10, %c0_11] : memref<9x1x128xf32, #tpu.memory_space<vmem>>, vector<1x1x128xf32>
    %14 = vector.shape_cast %13 : vector<1x1x128xf32> to vector<1x128xf32>
    %15 = vector.broadcast %14 : vector<1x128xf32> to vector<8x128xf32>
    %16 = arith.mulf %12, %15 : vector<8x128xf32>
    %c7_i32 = arith.constant 7 : i32
    %17 = tpu.dynamic_rotate %4 by %c7_i32 dim 1 : vector<8x128xf32>, i32 -> vector<8x128xf32>
    %c2 = arith.constant 2 : index
    %c0_12 = arith.constant 0 : index
    %c0_13 = arith.constant 0 : index
    %18 = vector.load %arg4[%c2, %c0_12, %c0_13] : memref<9x1x128xf32, #tpu.memory_space<vmem>>, vector<1x1x128xf32>
    %19 = vector.shape_cast %18 : vector<1x1x128xf32> to vector<1x128xf32>
    %20 = vector.broadcast %19 : vector<1x128xf32> to vector<8x128xf32>
    %21 = arith.mulf %17, %20 : vector<8x128xf32>
    %c1_i32 = arith.constant 1 : i32
    %22 = tpu.dynamic_rotate %4 by %c1_i32 dim 1 : vector<8x128xf32>, i32 -> vector<8x128xf32>
    %c3 = arith.constant 3 : index
    %c0_14 = arith.constant 0 : index
    %c0_15 = arith.constant 0 : index
    %23 = vector.load %arg4[%c3, %c0_14, %c0_15] : memref<9x1x128xf32, #tpu.memory_space<vmem>>, vector<1x1x128xf32>
    %24 = vector.shape_cast %23 : vector<1x1x128xf32> to vector<1x128xf32>
    %25 = vector.broadcast %24 : vector<1x128xf32> to vector<8x128xf32>
    %26 = arith.mulf %22, %25 : vector<8x128xf32>
    %c4 = arith.constant 4 : index
    %c0_16 = arith.constant 0 : index
    %c0_17 = arith.constant 0 : index
    %27 = vector.load %arg4[%c4, %c0_16, %c0_17] : memref<9x1x128xf32, #tpu.memory_space<vmem>>, vector<1x1x128xf32>
    %28 = vector.shape_cast %27 : vector<1x1x128xf32> to vector<1x128xf32>
    %29 = vector.broadcast %28 : vector<1x128xf32> to vector<8x128xf32>
    %30 = arith.mulf %4, %29 : vector<8x128xf32>
    %c127_i32 = arith.constant 127 : i32
    %31 = tpu.dynamic_rotate %4 by %c127_i32 dim 1 : vector<8x128xf32>, i32 -> vector<8x128xf32>
    %c5 = arith.constant 5 : index
    %c0_18 = arith.constant 0 : index
    %c0_19 = arith.constant 0 : index
    %32 = vector.load %arg4[%c5, %c0_18, %c0_19] : memref<9x1x128xf32, #tpu.memory_space<vmem>>, vector<1x1x128xf32>
    %33 = vector.shape_cast %32 : vector<1x1x128xf32> to vector<1x128xf32>
    %34 = vector.broadcast %33 : vector<1x128xf32> to vector<8x128xf32>
    %35 = arith.mulf %31, %34 : vector<8x128xf32>
    %c121_i32 = arith.constant 121 : i32
    %36 = tpu.dynamic_rotate %4 by %c121_i32 dim 1 : vector<8x128xf32>, i32 -> vector<8x128xf32>
    %c6 = arith.constant 6 : index
    %c0_20 = arith.constant 0 : index
    %c0_21 = arith.constant 0 : index
    %37 = vector.load %arg4[%c6, %c0_20, %c0_21] : memref<9x1x128xf32, #tpu.memory_space<vmem>>, vector<1x1x128xf32>
    %38 = vector.shape_cast %37 : vector<1x1x128xf32> to vector<1x128xf32>
    %39 = vector.broadcast %38 : vector<1x128xf32> to vector<8x128xf32>
    %40 = arith.mulf %36, %39 : vector<8x128xf32>
    %c120_i32 = arith.constant 120 : i32
    %41 = tpu.dynamic_rotate %4 by %c120_i32 dim 1 : vector<8x128xf32>, i32 -> vector<8x128xf32>
    %c7 = arith.constant 7 : index
    %c0_22 = arith.constant 0 : index
    %c0_23 = arith.constant 0 : index
    %42 = vector.load %arg4[%c7, %c0_22, %c0_23] : memref<9x1x128xf32, #tpu.memory_space<vmem>>, vector<1x1x128xf32>
    %43 = vector.shape_cast %42 : vector<1x1x128xf32> to vector<1x128xf32>
    %44 = vector.broadcast %43 : vector<1x128xf32> to vector<8x128xf32>
    %45 = arith.mulf %41, %44 : vector<8x128xf32>
    %c119_i32 = arith.constant 119 : i32
    %46 = tpu.dynamic_rotate %4 by %c119_i32 dim 1 : vector<8x128xf32>, i32 -> vector<8x128xf32>
    %c8 = arith.constant 8 : index
    %c0_24 = arith.constant 0 : index
    %c0_25 = arith.constant 0 : index
    %47 = vector.load %arg4[%c8, %c0_24, %c0_25] : memref<9x1x128xf32, #tpu.memory_space<vmem>>, vector<1x1x128xf32>
    %48 = vector.shape_cast %47 : vector<1x1x128xf32> to vector<1x128xf32>
    %49 = vector.broadcast %48 : vector<1x128xf32> to vector<8x128xf32>
    %50 = arith.mulf %46, %49 : vector<8x128xf32>
    %51 = tpu.concatenate %11, %16, %21, %26, %30, %35, %40, %45, %50 in 0 : vector<8x128xf32>, vector<8x128xf32>, vector<8x128xf32>, vector<8x128xf32>, vector<8x128xf32>, vector<8x128xf32>, vector<8x128xf32>, vector<8x128xf32>, vector<8x128xf32> -> vector<72x128xf32>
    %52 = arith.truncf %51 : vector<72x128xf32> to vector<72x128xbf16>
    %c9_i32_26 = arith.constant 9 : i32
    %53 = tpu.dynamic_rotate %5 by %c9_i32_26 dim 1 : vector<64x128xf32>, i32 -> vector<64x128xf32>
    %c0_27 = arith.constant 0 : index
    %c0_28 = arith.constant 0 : index
    %c0_29 = arith.constant 0 : index
    %54 = vector.load %arg4[%c0_27, %c0_28, %c0_29] : memref<9x1x128xf32, #tpu.memory_space<vmem>>, vector<1x1x128xf32>
    %55 = vector.shape_cast %54 : vector<1x1x128xf32> to vector<1x128xf32>
    %56 = vector.broadcast %55 : vector<1x128xf32> to vector<64x128xf32>
    %57 = arith.mulf %53, %56 : vector<64x128xf32>
    %c8_i32_30 = arith.constant 8 : i32
    %58 = tpu.dynamic_rotate %5 by %c8_i32_30 dim 1 : vector<64x128xf32>, i32 -> vector<64x128xf32>
    %c1_31 = arith.constant 1 : index
    %c0_32 = arith.constant 0 : index
    %c0_33 = arith.constant 0 : index
    %59 = vector.load %arg4[%c1_31, %c0_32, %c0_33] : memref<9x1x128xf32, #tpu.memory_space<vmem>>, vector<1x1x128xf32>
    %60 = vector.shape_cast %59 : vector<1x1x128xf32> to vector<1x128xf32>
    %61 = vector.broadcast %60 : vector<1x128xf32> to vector<64x128xf32>
    %62 = arith.mulf %58, %61 : vector<64x128xf32>
    %c7_i32_34 = arith.constant 7 : i32
    %63 = tpu.dynamic_rotate %5 by %c7_i32_34 dim 1 : vector<64x128xf32>, i32 -> vector<64x128xf32>
    %c2_35 = arith.constant 2 : index
    %c0_36 = arith.constant 0 : index
    %c0_37 = arith.constant 0 : index
    %64 = vector.load %arg4[%c2_35, %c0_36, %c0_37] : memref<9x1x128xf32, #tpu.memory_space<vmem>>, vector<1x1x128xf32>
    %65 = vector.shape_cast %64 : vector<1x1x128xf32> to vector<1x128xf32>
    %66 = vector.broadcast %65 : vector<1x128xf32> to vector<64x128xf32>
    %67 = arith.mulf %63, %66 : vector<64x128xf32>
    %c1_i32_38 = arith.constant 1 : i32
    %68 = tpu.dynamic_rotate %5 by %c1_i32_38 dim 1 : vector<64x128xf32>, i32 -> vector<64x128xf32>
    %c3_39 = arith.constant 3 : index
    %c0_40 = arith.constant 0 : index
    %c0_41 = arith.constant 0 : index
    %69 = vector.load %arg4[%c3_39, %c0_40, %c0_41] : memref<9x1x128xf32, #tpu.memory_space<vmem>>, vector<1x1x128xf32>
    %70 = vector.shape_cast %69 : vector<1x1x128xf32> to vector<1x128xf32>
    %71 = vector.broadcast %70 : vector<1x128xf32> to vector<64x128xf32>
    %72 = arith.mulf %68, %71 : vector<64x128xf32>
    %c4_42 = arith.constant 4 : index
    %c0_43 = arith.constant 0 : index
    %c0_44 = arith.constant 0 : index
    %73 = vector.load %arg4[%c4_42, %c0_43, %c0_44] : memref<9x1x128xf32, #tpu.memory_space<vmem>>, vector<1x1x128xf32>
    %74 = vector.shape_cast %73 : vector<1x1x128xf32> to vector<1x128xf32>
    %75 = vector.broadcast %74 : vector<1x128xf32> to vector<64x128xf32>
    %76 = arith.mulf %5, %75 : vector<64x128xf32>
    %c127_i32_45 = arith.constant 127 : i32
    %77 = tpu.dynamic_rotate %5 by %c127_i32_45 dim 1 : vector<64x128xf32>, i32 -> vector<64x128xf32>
    %c5_46 = arith.constant 5 : index
    %c0_47 = arith.constant 0 : index
    %c0_48 = arith.constant 0 : index
    %78 = vector.load %arg4[%c5_46, %c0_47, %c0_48] : memref<9x1x128xf32, #tpu.memory_space<vmem>>, vector<1x1x128xf32>
    %79 = vector.shape_cast %78 : vector<1x1x128xf32> to vector<1x128xf32>
    %80 = vector.broadcast %79 : vector<1x128xf32> to vector<64x128xf32>
    %81 = arith.mulf %77, %80 : vector<64x128xf32>
    %c121_i32_49 = arith.constant 121 : i32
    %82 = tpu.dynamic_rotate %5 by %c121_i32_49 dim 1 : vector<64x128xf32>, i32 -> vector<64x128xf32>
    %c6_50 = arith.constant 6 : index
    %c0_51 = arith.constant 0 : index
    %c0_52 = arith.constant 0 : index
    %83 = vector.load %arg4[%c6_50, %c0_51, %c0_52] : memref<9x1x128xf32, #tpu.memory_space<vmem>>, vector<1x1x128xf32>
    %84 = vector.shape_cast %83 : vector<1x1x128xf32> to vector<1x128xf32>
    %85 = vector.broadcast %84 : vector<1x128xf32> to vector<64x128xf32>
    %86 = arith.mulf %82, %85 : vector<64x128xf32>
    %c120_i32_53 = arith.constant 120 : i32
    %87 = tpu.dynamic_rotate %5 by %c120_i32_53 dim 1 : vector<64x128xf32>, i32 -> vector<64x128xf32>
    %c7_54 = arith.constant 7 : index
    %c0_55 = arith.constant 0 : index
    %c0_56 = arith.constant 0 : index
    %88 = vector.load %arg4[%c7_54, %c0_55, %c0_56] : memref<9x1x128xf32, #tpu.memory_space<vmem>>, vector<1x1x128xf32>
    %89 = vector.shape_cast %88 : vector<1x1x128xf32> to vector<1x128xf32>
    %90 = vector.broadcast %89 : vector<1x128xf32> to vector<64x128xf32>
    %91 = arith.mulf %87, %90 : vector<64x128xf32>
    %c119_i32_57 = arith.constant 119 : i32
    %92 = tpu.dynamic_rotate %5 by %c119_i32_57 dim 1 : vector<64x128xf32>, i32 -> vector<64x128xf32>
    %c8_58 = arith.constant 8 : index
    %c0_59 = arith.constant 0 : index
    %c0_60 = arith.constant 0 : index
    %93 = vector.load %arg4[%c8_58, %c0_59, %c0_60] : memref<9x1x128xf32, #tpu.memory_space<vmem>>, vector<1x1x128xf32>
    %94 = vector.shape_cast %93 : vector<1x1x128xf32> to vector<1x128xf32>
    %95 = vector.broadcast %94 : vector<1x128xf32> to vector<64x128xf32>
    %96 = arith.mulf %92, %95 : vector<64x128xf32>
    %97 = tpu.concatenate %57, %62, %67, %72, %76, %81, %86, %91, %96 in 0 : vector<64x128xf32>, vector<64x128xf32>, vector<64x128xf32>, vector<64x128xf32>, vector<64x128xf32>, vector<64x128xf32>, vector<64x128xf32>, vector<64x128xf32>, vector<64x128xf32> -> vector<576x128xf32>
    %98 = arith.truncf %97 : vector<576x128xf32> to vector<576x128xbf16>
    %c0_61 = arith.constant 0 : index
    %c0_62 = arith.constant 0 : index
    %99 = vector.load %arg5[%c0_61, %c0_62] : memref<256x72xbf16, #tpu.memory_space<vmem>>, vector<256x72xbf16>
    %cst = arith.constant dense<0.000000e+00> : vector<256x128xf32>
    %100 = tpu.matmul %99, %52, %cst {dimension_numbers = #tpu.dot_dimension_numbers<[1], [0], [0], [1], [0, 0, 1, 1], [], []>} : vector<256x72xbf16>, vector<72x128xbf16>, vector<256x128xf32> -> vector<256x128xf32>
    %c0_63 = arith.constant 0 : index
    %c0_64 = arith.constant 0 : index
    %101 = vector.load %arg6[%c0_63, %c0_64] : memref<256x576xbf16, #tpu.memory_space<vmem>>, vector<256x576xbf16>
    %cst_65 = arith.constant dense<0.000000e+00> : vector<256x128xf32>
    %102 = tpu.matmul %101, %98, %cst_65 {dimension_numbers = #tpu.dot_dimension_numbers<[1], [0], [0], [1], [0, 0, 1, 1], [], []>} : vector<256x576xbf16>, vector<576x128xbf16>, vector<256x128xf32> -> vector<256x128xf32>
    %103 = arith.addf %100, %102 : vector<256x128xf32>
    %c0_66 = arith.constant 0 : index
    %c0_67 = arith.constant 0 : index
    %104 = vector.load %arg7[%c0_66, %c0_67] : memref<256x1xf32, #tpu.memory_space<vmem>>, vector<256x1xf32>
    %105 = vector.broadcast %104 : vector<256x1xf32> to vector<256x128xf32>
    %106 = arith.addf %103, %105 : vector<256x128xf32>
    %107 = vector.extract_strided_slice %106 {offsets = [0, 0], sizes = [64, 128], strides = [1, 1]} : vector<256x128xf32> to vector<64x128xf32>
    %108 = arith.negf %107 : vector<64x128xf32>
    %109 = math.exp %108 : vector<64x128xf32>
    %cst_68 = arith.constant 1.000000e+00 : f32
    %110 = vector.broadcast %cst_68 : f32 to vector<64x128xf32>
    %111 = arith.addf %110, %109 : vector<64x128xf32>
    %112 = arith.divf %110, %111 : vector<64x128xf32>
    %113 = vector.extract_strided_slice %106 {offsets = [64, 0], sizes = [64, 128], strides = [1, 1]} : vector<256x128xf32> to vector<64x128xf32>
    %114 = arith.negf %113 : vector<64x128xf32>
    %115 = math.exp %114 : vector<64x128xf32>
    %cst_69 = arith.constant 1.000000e+00 : f32
    %116 = vector.broadcast %cst_69 : f32 to vector<64x128xf32>
    %117 = arith.addf %116, %115 : vector<64x128xf32>
    %118 = arith.divf %116, %117 : vector<64x128xf32>
    %119 = vector.extract_strided_slice %106 {offsets = [128, 0], sizes = [64, 128], strides = [1, 1]} : vector<256x128xf32> to vector<64x128xf32>
    %120 = arith.negf %119 : vector<64x128xf32>
    %121 = math.exp %120 : vector<64x128xf32>
    %cst_70 = arith.constant 1.000000e+00 : f32
    %122 = vector.broadcast %cst_70 : f32 to vector<64x128xf32>
    %123 = arith.addf %122, %121 : vector<64x128xf32>
    %124 = arith.divf %122, %123 : vector<64x128xf32>
    %125 = vector.extract_strided_slice %106 {offsets = [192, 0], sizes = [64, 128], strides = [1, 1]} : vector<256x128xf32> to vector<64x128xf32>
    %126 = math.tanh %125 : vector<64x128xf32>
    %127 = arith.mulf %118, %6 : vector<64x128xf32>
    %128 = arith.mulf %112, %126 : vector<64x128xf32>
    %129 = arith.addf %127, %128 : vector<64x128xf32>
    %130 = math.tanh %129 : vector<64x128xf32>
    %131 = arith.mulf %124, %130 : vector<64x128xf32>
    %c0_71 = arith.constant 0 : index
    %c0_72 = arith.constant 0 : index
    %132 = vector.load %arg13[%c0_71, %c0_72] : memref<64x128xf32, #tpu.memory_space<vmem>>, vector<64x128xf32>
    tpu.vector_store %arg13[%c0_71, %c0_72], %131 {strides = array<i32>} : memref<64x128xf32, #tpu.memory_space<vmem>>, vector<64x128xf32>,
    %c0_73 = arith.constant 0 : index
    %c0_74 = arith.constant 0 : index
    %133 = vector.load %arg14[%c0_73, %c0_74] : memref<64x128xf32, #tpu.memory_space<vmem>>, vector<64x128xf32>
    tpu.vector_store %arg14[%c0_73, %c0_74], %129 {strides = array<i32>} : memref<64x128xf32, #tpu.memory_space<vmem>>, vector<64x128xf32>,
    %c0_75 = arith.constant 0 : index
    %c0_76 = arith.constant 0 : index
    %134 = vector.load %arg11[%c0_75, %c0_76] : memref<64x128xf32, #tpu.memory_space<vmem>>, vector<64x128xf32>
    tpu.vector_store %arg11[%c0_75, %c0_76], %131 {strides = array<i32>} : memref<64x128xf32, #tpu.memory_space<vmem>>, vector<64x128xf32>,
    %c0_77 = arith.constant 0 : index
    %c0_78 = arith.constant 0 : index
    %135 = vector.load %arg12[%c0_77, %c0_78] : memref<64x128xf32, #tpu.memory_space<vmem>>, vector<64x128xf32>
    tpu.vector_store %arg12[%c0_77, %c0_78], %129 {strides = array<i32>} : memref<64x128xf32, #tpu.memory_space<vmem>>, vector<64x128xf32>,
    %c0_79 = arith.constant 0 : index
    %c0_80 = arith.constant 0 : index
    %136 = vector.load %arg8[%c0_79, %c0_80] : memref<3x64xbf16, #tpu.memory_space<vmem>>, vector<3x64xbf16>
    %137 = arith.truncf %131 : vector<64x128xf32> to vector<64x128xbf16>
    %cst_81 = arith.constant dense<0.000000e+00> : vector<3x128xf32>
    %138 = tpu.matmul %136, %137, %cst_81 {dimension_numbers = #tpu.dot_dimension_numbers<[1], [0], [0], [1], [0, 0, 1, 1], [], []>} : vector<3x64xbf16>, vector<64x128xbf16>, vector<3x128xf32> -> vector<3x128xf32>
    %c0_82 = arith.constant 0 : index
    %c0_83 = arith.constant 0 : index
    %139 = vector.load %arg9[%c0_82, %c0_83] : memref<3x1xf32, #tpu.memory_space<vmem>>, vector<3x1xf32>
    %140 = vector.broadcast %139 : vector<3x1xf32> to vector<3x128xf32>
    %141 = arith.addf %138, %140 : vector<3x128xf32>
    %142 = arith.negf %141 : vector<3x128xf32>
    %143 = math.exp %142 : vector<3x128xf32>
    %cst_84 = arith.constant 1.000000e+00 : f32
    %144 = vector.broadcast %cst_84 : f32 to vector<3x128xf32>
    %145 = arith.addf %144, %143 : vector<3x128xf32>
    %146 = arith.divf %144, %145 : vector<3x128xf32>
    %c0_85 = arith.constant 0 : index
    %c0_86 = arith.constant 0 : index
    %c0_87 = arith.constant 0 : index
    %147 = vector.load %arg10[%c0_85, %c0_86, %c0_87] : memref<1x3x128xf32, #tpu.memory_space<vmem>>, vector<1x3x128xf32>
    %148 = vector.shape_cast %147 : vector<1x3x128xf32> to vector<3x128xf32>
    %149 = vector.shape_cast %146 : vector<3x128xf32> to vector<1x3x128xf32>
    tpu.vector_store %arg10[%c0_85, %c0_86, %c0_87], %149 {strides = array<i32>} : memref<1x3x128xf32, #tpu.memory_space<vmem>>, vector<1x3x128xf32>,
    return
  }
  func.func @transform_0(%arg0: i32) -> (i32, i32, i32) {
    %c0_i32 = arith.constant 0 : i32
    %c0_i32_0 = arith.constant 0 : i32
    %c0_i32_1 = arith.constant 0 : i32
    return %arg0, %c0_i32, %c0_i32_0 : i32, i32, i32
  }
  func.func @transform_1(%arg0: i32) -> (i32, i32) {
    %c0_i32 = arith.constant 0 : i32
    %c0_i32_0 = arith.constant 0 : i32
    %c0_i32_1 = arith.constant 0 : i32
    return %c0_i32, %c0_i32_0 : i32, i32
  }
  func.func @transform_2(%arg0: i32) -> (i32, i32) {
    %c0_i32 = arith.constant 0 : i32
    %c0_i32_0 = arith.constant 0 : i32
    %c0_i32_1 = arith.constant 0 : i32
    return %c0_i32, %c0_i32_0 : i32, i32
  }
  func.func @transform_3(%arg0: i32) -> (i32, i32, i32) {
    %c0_i32 = arith.constant 0 : i32
    %c0_i32_0 = arith.constant 0 : i32
    %c0_i32_1 = arith.constant 0 : i32
    %c0_i32_2 = arith.constant 0 : i32
    return %c0_i32, %c0_i32_0, %c0_i32_1 : i32, i32, i32
  }
  func.func @transform_4(%arg0: i32) -> (i32, i32) {
    %c0_i32 = arith.constant 0 : i32
    %c0_i32_0 = arith.constant 0 : i32
    %c0_i32_1 = arith.constant 0 : i32
    return %c0_i32, %c0_i32_0 : i32, i32
  }
  func.func @transform_5(%arg0: i32) -> (i32, i32) {
    %c0_i32 = arith.constant 0 : i32
    %c0_i32_0 = arith.constant 0 : i32
    %c0_i32_1 = arith.constant 0 : i32
    return %c0_i32, %c0_i32_0 : i32, i32
  }
  func.func @transform_6(%arg0: i32) -> (i32, i32) {
    %c0_i32 = arith.constant 0 : i32
    %c0_i32_0 = arith.constant 0 : i32
    %c0_i32_1 = arith.constant 0 : i32
    return %c0_i32, %c0_i32_0 : i32, i32
  }
  func.func @transform_7(%arg0: i32) -> (i32, i32) {
    %c0_i32 = arith.constant 0 : i32
    %c0_i32_0 = arith.constant 0 : i32
    %c0_i32_1 = arith.constant 0 : i32
    return %c0_i32, %c0_i32_0 : i32, i32
  }
  func.func @transform_8(%arg0: i32) -> (i32, i32) {
    %c0_i32 = arith.constant 0 : i32
    %c0_i32_0 = arith.constant 0 : i32
    %c0_i32_1 = arith.constant 0 : i32
    return %c0_i32, %c0_i32_0 : i32, i32
  }
  func.func @transform_9(%arg0: i32) -> (i32, i32, i32) {
    %c0_i32 = arith.constant 0 : i32
    %c0_i32_0 = arith.constant 0 : i32
    %c0_i32_1 = arith.constant 0 : i32
    return %arg0, %c0_i32, %c0_i32_0 : i32, i32, i32
  }
  func.func @transform_10(%arg0: i32) -> (i32, i32) {
    %c0_i32 = arith.constant 0 : i32
    %c0_i32_0 = arith.constant 0 : i32
    %c0_i32_1 = arith.constant 0 : i32
    return %c0_i32, %c0_i32_0 : i32, i32
  }
  func.func @transform_11(%arg0: i32) -> (i32, i32) {
    %c0_i32 = arith.constant 0 : i32
    %c0_i32_0 = arith.constant 0 : i32
    %c0_i32_1 = arith.constant 0 : i32
    return %c0_i32, %c0_i32_0 : i32, i32
  }
}

</mosaic_0001>

<bundles_post_ra>
// kernel: encoder_rnn_forward_seq.1
= control target key start
LH: loop header
LB: loop body
LE: loop exit
PB: predicated region body
PF: predicated region fallthrough
CT: control target
= control target key end

     0   :  { %17 = vsyncpa [#allocation5], 0  ;;  %s3183_s19 = smov 8   ;;  %s3184_s20 = smov 1   ;;  %s4248_s0 = inlined_call_operand.vmem [shape: f32[1,8,128], index: 0, kind: input, shape index: {}]   ;;  %s4249_s1 = inlined_call_operand.vmem [shape: f32[64,128], index: 1, kind: input, shape index: {}]   ;;  %s4250_s2 = inlined_call_operand.vmem [shape: f32[64,128], index: 2, kind: input, shape index: {}]   ;;  %s4251_s3 = inlined_call_operand.vmem [shape: f32[9,1,128], index: 3, kind: input, shape index: {}]   ;;  %s4252_s4 = inlined_call_operand.vmem [shape: bf16[256,72], index: 4, kind: input, shape index: {}]   ;;  %s4253_s5 = inlined_call_operand.vmem [shape: bf16[256,576], index: 5, kind: input, shape index: {}]   ;;  %s4254_s6 = inlined_call_operand.vmem [shape: f32[256,1], index: 6, kind: input, shape index: {}]   ;;  %s4255_s7 = inlined_call_operand.vmem [shape: bf16[3,64], index: 7, kind: input, shape index: {}]   ;;  %s4256_s8 = inlined_call_operand.vmem [shape: f32[3,1], index: 8, kind: input, shape index: {}]   ;;  %s4257_s9 = inlined_call_operand.vmem [shape: f32[1,3,128], index: 9, kind: output, shape index: {0}]   ;;  %s4258_s10 = inlined_call_operand.hbm [shape: f32[64,128], index: 10, kind: output, shape index: {1}]   ;;  %s4259_s11 = inlined_call_operand.hbm [shape: f32[64,128], index: 11, kind: output, shape index: {2}]  }
   0x1   :  { %v3260_v0 = vld [vmem:[%s4249_s1 + $0x30] sm:$0xff]  ;;  %v3269_v1 = vld [vmem:[%s4249_s1 + $0x38] sm:$0xff]  ;;  %s3185_s23 = smov 120   ;;  %v3282_v2 = vld [vmem:[%s4249_s1 + $0x28] sm:$0xff]  ;;  %s3186_s28 = smov 127  }
   0x2   :  { %228 = vrot.lane.b32.xlu1 %v3260_v0, %s3183_s19  ;;  %276 = vrot.lane.b32.xlu0 %v3260_v0, %s3184_s20  ;;  %v3287_v3 = vld [vmem:[%s4249_s1 + $0x20] sm:$0xff]  ;;  %v3308_v4 = vld [vmem:[%s4249_s1 + $0x18] sm:$0xff] }
   0x3   :  { %v3313_v5 = vld [vmem:[%s4249_s1 + $0x10] sm:$0xff]  ;;  %v3334_v6 = vld [vmem:[%s4249_s1 + $0x8] sm:$0xff]  ;;  %v3339_v7 = vld [vmem:[%s4249_s1] sm:$0xff] }
   0x6   :  { %230 = vrot.lane.b32.xlu1 %v3269_v1, %s3183_s19  ;;  %278 = vrot.lane.b32.xlu0 %v3269_v1, %s3184_s20 }
   0xa   :  { %358 = vrot.lane.b32.xlu1 %v3269_v1, %s3185_s23  ;;  %356 = vrot.lane.b32.xlu0 %v3260_v0, %s3185_s23 }
   0xe   :  { %310 = vrot.lane.b32.xlu1 %v3269_v1, %s3186_s28  ;;  %308 = vrot.lane.b32.xlu0 %v3260_v0, %s3186_s28 }
  0x12   :  { %274 = vrot.lane.b32.xlu1 %v3282_v2, %s3184_s20  ;;  %272 = vrot.lane.b32.xlu0 %v3287_v3, %s3184_s20 }
  0x16   :  { %226 = vrot.lane.b32.xlu1 %v3282_v2, %s3183_s19  ;;  %224 = vrot.lane.b32.xlu0 %v3287_v3, %s3183_s19 }
  0x1a   :  { %354 = vrot.lane.b32.xlu1 %v3282_v2, %s3185_s23  ;;  %352 = vrot.lane.b32.xlu0 %v3287_v3, %s3185_s23 }
  0x1e   :  { %306 = vrot.lane.b32.xlu1 %v3282_v2, %s3186_s28  ;;  %304 = vrot.lane.b32.xlu0 %v3287_v3, %s3186_s28 }
  0x22   :  { %270 = vrot.lane.b32.xlu1 %v3308_v4, %s3184_s20  ;;  %268 = vrot.lane.b32.xlu0 %v3313_v5, %s3184_s20 }
  0x26   :  { %222 = vrot.lane.b32.xlu1 %v3308_v4, %s3183_s19  ;;  %220 = vrot.lane.b32.xlu0 %v3313_v5, %s3183_s19 }
  0x2a   :  { %350 = vrot.lane.b32.xlu1 %v3308_v4, %s3185_s23  ;;  %348 = vrot.lane.b32.xlu0 %v3313_v5, %s3185_s23 }
  0x2e   :  { %302 = vrot.lane.b32.xlu1 %v3308_v4, %s3186_s28  ;;  %300 = vrot.lane.b32.xlu0 %v3313_v5, %s3186_s28 }
  0x32   :  { %266 = vrot.lane.b32.xlu1 %v3334_v6, %s3184_s20  ;;  %264 = vrot.lane.b32.xlu0 %v3339_v7, %s3184_s20 }
  0x33   :  { %18 = vsyncpa [#allocation7], 0  ;;  %s3187_s1 = smov 7   ;;  %s3188_s18 = smov 9   ;;  %v2881_v8 = vld [vmem:[%s4253_s5 + $0x4] ss:$20 sps:$4 sm:$0xff]  }
  0x34   :  { %s3189_s21 = smov 121   ;;  %1037 = vmatprep.mubr.bf16.mxu0 %v2881_v8  ;;  %v2884_v9 = vld [vmem:[%s4253_s5 + $0xc] ss:$20 sps:$4 sm:$0xff]   ;;  %s3190_s30 = smov 119   ;;  %v3445_v21 = vld [vmem:[%s4251_s3 + $0x7] ss:$0 sm:$0xff] }
  0x35   :  { %1198 = vmatprep.mubr.bf16.mxu1 %v2884_v9  ;;  %v3418_v10 = vld [vmem:[%s4248_s0] sm:$0xff]  ;;  %vm1617_vm0 = vcmask 1043456   ;;  %vm956_vm1 = vcmask 523264   ;;  %vm1568_vm2 = vcmask 588800   ;;  %vm3193_vm3 = vmmov 0   ;;  %s3194_s16 = smov [#allocation4]  }
  0x36   :  { %218 = vrot.lane.b32.xlu1 %v3334_v6, %s3183_s19  ;;  %216 = vrot.lane.b32.xlu0 %v3339_v7, %s3183_s19  ;;  %v3427_v13 = vld [vmem:[%s4251_s3 + $0x1] ss:$0 sm:$0xff]  ;;  %v3432_v14 = vld [vmem:[%s4251_s3 + $0x3] ss:$0 sm:$0xff]  ;;  %s3195_s17 = smov [#allocation6]  }
  0x37   :  { %v3456_v28 = vld [vmem:[%s4251_s3 + $0x5] ss:$0 sm:$0xff] }
  0x3a   :  { %346 = vrot.lane.b32.xlu1 %v3334_v6, %s3185_s23  ;;  %344 = vrot.lane.b32.xlu0 %v3339_v7, %s3185_s23 }
  0x3e   :  { %298 = vrot.lane.b32.xlu1 %v3334_v6, %s3186_s28  ;;  %296 = vrot.lane.b32.xlu0 %v3339_v7, %s3186_s28 }
  0x42   :  { %254 = vrot.lane.b32.xlu1 %v3269_v1, %s3187_s1  ;;  %252 = vrot.lane.b32.xlu0 %v3260_v0, %s3187_s1 }
  0x46   :  { %206 = vrot.lane.b32.xlu1 %v3269_v1, %s3188_s18  ;;  %204 = vrot.lane.b32.xlu0 %v3260_v0, %s3188_s18 }
  0x4a   :  { %334 = vrot.lane.b32.xlu1 %v3269_v1, %s3189_s21  ;;  %332 = vrot.lane.b32.xlu0 %v3260_v0, %s3189_s21 }
  0x4e   :  { %250 = vrot.lane.b32.xlu1 %v3282_v2, %s3187_s1  ;;  %248 = vrot.lane.b32.xlu0 %v3287_v3, %s3187_s1 }
  0x52   :  { %202 = vrot.lane.b32.xlu1 %v3282_v2, %s3188_s18  ;;  %200 = vrot.lane.b32.xlu0 %v3287_v3, %s3188_s18 }
  0x56   :  { %330 = vrot.lane.b32.xlu1 %v3282_v2, %s3189_s21  ;;  %328 = vrot.lane.b32.xlu0 %v3287_v3, %s3189_s21 }
  0x5a   :  { %246 = vrot.lane.b32.xlu1 %v3308_v4, %s3187_s1  ;;  %244 = vrot.lane.b32.xlu0 %v3313_v5, %s3187_s1 }
  0x5e   :  { %198 = vrot.lane.b32.xlu1 %v3308_v4, %s3188_s18  ;;  %196 = vrot.lane.b32.xlu0 %v3313_v5, %s3188_s18 }
  0x62   :  { %326 = vrot.lane.b32.xlu1 %v3308_v4, %s3189_s21  ;;  %324 = vrot.lane.b32.xlu0 %v3313_v5, %s3189_s21 }
  0x66   :  { %242 = vrot.lane.b32.xlu1 %v3334_v6, %s3187_s1  ;;  %240 = vrot.lane.b32.xlu0 %v3339_v7, %s3187_s1 }
  0x6a   :  { %194 = vrot.lane.b32.xlu1 %v3334_v6, %s3188_s18  ;;  %192 = vrot.lane.b32.xlu0 %v3339_v7, %s3188_s18 }
  0x6e   :  { %322 = vrot.lane.b32.xlu1 %v3334_v6, %s3189_s21  ;;  %320 = vrot.lane.b32.xlu0 %v3339_v7, %s3189_s21 }
  0x72   :  { %176 = vrot.lane.b32.xlu0 %v3418_v10, %s3190_s30  ;;  %380 = vrot.lane.b32.xlu1 %v3260_v0, %s3190_s30 }
  0x74   :  { %v229_v11 = vpop.permute.xlu1 %228  ;;  %v277_v12 = vpop.permute.xlu0 %276 }
  0x75   :  { %v238_v17 = vmul.f32 %v3427_v13, %v229_v11  ;;  %v286_v18 = vmul.f32 %v3432_v14, %v277_v12 }
  0x76   :  { %382 = vrot.lane.b32.xlu0 %v3269_v1, %s3190_s30  ;;  %154 = vrot.lane.b32.xlu1 %v3418_v10, %s3189_s21  ;;  %s2310_s21 = sshll.u32 %s3195_s17, 4  ;;  %s2311_s21 = int_to_ptr.vmem [resolvable:$true] %s2310_s21 }
  0x78   :  { %v231_v15 = vpop.permute.xlu1 %230  ;;  %v279_v16 = vpop.permute.xlu0 %278 }
  0x79   :  { %v239_v19 = vmul.f32 %v3427_v13, %v231_v15  ;;  %v287_v20 = vmul.f32 %v3432_v14, %v279_v16 }
  0x7a   :  { %165 = vrot.lane.b32.xlu0 %v3418_v10, %s3185_s23  ;;  %376 = vrot.lane.b32.xlu1 %v3287_v3, %s3190_s30 }
  0x7b   :  { %v407_v22 = vpack.c.bf16 %v287_v20, %v286_v18  ;;  %v399_v23 = vpack.c.bf16 %v239_v19, %v238_v17 }
  0x7c   :  { %v359_v24 = vpop.permute.xlu1 %358  ;;  %v357_v25 = vpop.permute.xlu0 %356 }
  0x7d   :  { %v367_v26 = vmul.f32 %v3445_v21, %v359_v24  ;;  %v366_v27 = vmul.f32 %v3445_v21, %v357_v25  ;;  %2498 = vmatprep.subr.bf16.mxu0 %v407_v22 }
  0x7e   :  { %2499 = vmatpush3.bf16.msra.mxu0 %v399_v23  ;;  %378 = vrot.lane.b32.xlu0 %v3282_v2, %s3190_s30 }
  0x7f   :  { %v423_v29 = vpack.c.bf16 %v367_v26, %v366_v27  ;;  %143 = vrot.lane.b32.xlu1 %v3418_v10, %s3186_s28 }
  0x80   :  { %v311_v30 = vpop.permute.xlu1 %310  ;;  %v309_v31 = vpop.permute.xlu0 %308 }
  0x81   :  { %v319_v32 = vmul.f32 %v3456_v28, %v311_v30  ;;  %v318_v33 = vmul.f32 %v3456_v28, %v309_v31  ;;  %2610 = vmatprep.subr.bf16.mxu1 %v423_v29 }
  0x82   :  { %372 = vrot.lane.b32.xlu0 %v3313_v5, %s3190_s30 }
  0x83   :  { %v415_v34 = vpack.c.bf16 %v319_v32, %v318_v33  ;;  %374 = vrot.lane.b32.xlu1 %v3308_v4, %s3190_s30 }
  0x84   :  { %v275_v35 = vpop.permute.xlu1 %274  ;;  %v273_v36 = vpop.permute.xlu0 %272 }
  0x85   :  { %v285_v37 = vmul.f32 %v3432_v14, %v275_v35  ;;  %v284_v38 = vmul.f32 %v3432_v14, %v273_v36  ;;  %2611 = vmatpush3.bf16.msra.mxu1 %v415_v34 }
  0x86   :  { %112 = vrot.lane.b32.xlu0 %v3418_v10, %s3187_s1 }
  0x87   :  { %v406_v39 = vpack.c.bf16 %v285_v37, %v284_v38  ;;  %123 = vrot.lane.b32.xlu1 %v3418_v10, %s3184_s20 }
  0x88   :  { %v227_v40 = vpop.permute.xlu1 %226  ;;  %v225_v41 = vpop.permute.xlu0 %224 }
  0x89   :  { %v237_v42 = vmul.f32 %v3427_v13, %v227_v40  ;;  %v236_v43 = vmul.f32 %v3427_v13, %v225_v41  ;;  %2500 = vmatprep.subr.bf16.mxu0 %v406_v39 }
  0x8a   :  { %368 = vrot.lane.b32.xlu0 %v3339_v7, %s3190_s30 }
  0x8b   :  { %v398_v44 = vpack.c.bf16 %v237_v42, %v236_v43  ;;  %370 = vrot.lane.b32.xlu1 %v3334_v6, %s3190_s30  ;;  %v3507_v43 = vld [vmem:[%s4251_s3 + $0x2] ss:$0 sm:$0xff] }
  0x8c   :  { %v355_v45 = vpop.permute.xlu1 %354  ;;  %v353_v46 = vpop.permute.xlu0 %352 }
  0x8d   :  { %v365_v47 = vmul.f32 %v3445_v21, %v355_v45  ;;  %v364_v48 = vmul.f32 %v3445_v21, %v353_v46  ;;  %2501 = vmatpush3.bf16.msra.mxu0 %v398_v44 }
  0x8e   :  { %91 = vrot.lane.b32.xlu0 %v3418_v10, %s3188_s18 }
  0x8f   :  { %v422_v49 = vpack.c.bf16 %v365_v47, %v364_v48  ;;  %101 = vrot.lane.b32.xlu1 %v3418_v10, %s3183_s19 }
  0x90   :  { %v307_v50 = vpop.permute.xlu1 %306  ;;  %v305_v51 = vpop.permute.xlu0 %304 }
  0x91   :  { %v317_v52 = vmul.f32 %v3456_v28, %v307_v50  ;;  %v316_v53 = vmul.f32 %v3456_v28, %v305_v51  ;;  %2612 = vmatprep.subr.bf16.mxu1 %v422_v49  ;;  %v3514_v49 = vld [vmem:[%s4251_s3] ss:$0 sm:$0xff]  ;;  %v3519_v51 = vld [vmem:[%s4251_s3 + $0x4] ss:$0 sm:$0xff] }
  0x93   :  { %v414_v54 = vpack.c.bf16 %v317_v52, %v316_v53 }
  0x94   :  { %v271_v55 = vpop.permute.xlu1 %270  ;;  %v269_v56 = vpop.permute.xlu0 %268 }
  0x95   :  { %v283_v57 = vmul.f32 %v3432_v14, %v271_v55  ;;  %v282_v58 = vmul.f32 %v3432_v14, %v269_v56  ;;  %2613 = vmatpush3.bf16.msra.mxu1 %v414_v54  ;;  %v3526_v56 = vld [vmem:[%s4251_s3 + $0x6] ss:$0 sm:$0xff] }
  0x97   :  { %v405_v59 = vpack.c.bf16 %v283_v57, %v282_v58  ;;  %v294_v57 = vmul.f32 %v3519_v51, %v3260_v0  ;;  %v295_v58 = vmul.f32 %v3519_v51, %v3269_v1 }
  0x98   :  { %v223_v60 = vpop.permute.xlu1 %222  ;;  %v221_v61 = vpop.permute.xlu0 %220 }
  0x99   :  { %v235_v62 = vmul.f32 %v3427_v13, %v223_v60  ;;  %v234_v63 = vmul.f32 %v3427_v13, %v221_v61  ;;  %2502 = vmatprep.subr.bf16.mxu0 %v405_v59 }
  0x9b   :  { %v397_v8 = vpack.c.bf16 %v235_v62, %v234_v63 }
  0x9c   :  { %v351_v9 = vpop.permute.xlu1 %350  ;;  %v349_v11 = vpop.permute.xlu0 %348 }
  0x9d   :  { %v363_v12 = vmul.f32 %v3445_v21, %v351_v9  ;;  %v362_v15 = vmul.f32 %v3445_v21, %v349_v11  ;;  %2503 = vmatpush3.bf16.msra.mxu0 %v397_v8  ;;  %v411_v8 = vpack.c.bf16 %v295_v58, %v294_v57  ;;  %v288_v58 = vmul.f32 %v3519_v51, %v3339_v7 }
  0x9f   :  { %v421_v16 = vpack.c.bf16 %v363_v12, %v362_v15 }
  0xa0   :  { %v303_v17 = vpop.permute.xlu1 %302  ;;  %v301_v18 = vpop.permute.xlu0 %300 }
  0xa1   :  { %v315_v19 = vmul.f32 %v3456_v28, %v303_v17  ;;  %v314_v20 = vmul.f32 %v3456_v28, %v301_v18  ;;  %2614 = vmatprep.subr.bf16.mxu1 %v421_v16 }
  0xa3   :  { %v413_v22 = vpack.c.bf16 %v315_v19, %v314_v20  ;;  %v292_v20 = vmul.f32 %v3519_v51, %v3287_v3 }
  0xa4   :  { %v267_v23 = vpop.permute.xlu1 %266  ;;  %v265_v24 = vpop.permute.xlu0 %264 }
  0xa5   :  { %v281_v25 = vmul.f32 %v3432_v14, %v267_v23  ;;  %v280_v26 = vmul.f32 %v3432_v14, %v265_v24  ;;  %2615 = vmatpush3.bf16.msra.mxu1 %v413_v22  ;;  %v293_v22 = vmul.f32 %v3519_v51, %v3282_v2 }
  0xa7   :  { %v404_v27 = vpack.c.bf16 %v281_v25, %v280_v26 }
  0xa8   :  { %v219_v29 = vpop.permute.xlu1 %218  ;;  %v217_v30 = vpop.permute.xlu0 %216 }
  0xa9   :  { %v233_v31 = vmul.f32 %v3427_v13, %v219_v29  ;;  %v232_v32 = vmul.f32 %v3427_v13, %v217_v30  ;;  %2504 = vmatprep.subr.bf16.mxu0 %v404_v27  ;;  %v410_v29 = vpack.c.bf16 %v293_v22, %v292_v20  ;;  %v2887_v20 = vld [vmem:[%s4253_s5 + $0x28] ss:$20 sps:$4 sm:$0xff]  }
  0xab   :  { %v396_v33 = vpack.c.bf16 %v233_v31, %v232_v32 }
  0xac   :  { %v347_v34 = vpop.permute.xlu1 %346  ;;  %v345_v35 = vpop.permute.xlu0 %344 }
  0xad   :  { %v361_v36 = vmul.f32 %v3445_v21, %v347_v34  ;;  %v360_v37 = vmul.f32 %v3445_v21, %v345_v35  ;;  %2505 = vmatpush3.bf16.msra.mxu0 %v396_v33 }
  0xaf   :  { %v420_v38 = vpack.c.bf16 %v361_v36, %v360_v37 }
  0xb0   :  { %v299_v39 = vpop.permute.xlu1 %298  ;;  %v297_v40 = vpop.permute.xlu0 %296 }
  0xb1   :  { %v313_v41 = vmul.f32 %v3456_v28, %v299_v39  ;;  %v312_v42 = vmul.f32 %v3456_v28, %v297_v40  ;;  %2616 = vmatprep.subr.bf16.mxu1 %v420_v38  ;;  %v290_v38 = vmul.f32 %v3519_v51, %v3313_v5  ;;  %v291_v39 = vmul.f32 %v3519_v51, %v3308_v4 }
  0xb3   :  { %v412_v44 = vpack.c.bf16 %v313_v41, %v312_v42 }
  0xb4   :  { %v255_v45 = vpop.permute.xlu1 %254  ;;  %v253_v46 = vpop.permute.xlu0 %252 }
  0xb5   :  { %v263_v47 = vmul.f32 %v3507_v43, %v255_v45  ;;  %v262_v48 = vmul.f32 %v3507_v43, %v253_v46  ;;  %2617 = vmatpush3.bf16.msra.mxu1 %v412_v44  ;;  %v409_v46 = vpack.c.bf16 %v291_v39, %v290_v38 }
  0xb7   :  { %v403_v50 = vpack.c.bf16 %v263_v47, %v262_v48 }
  0xb8   :  { %v207_v52 = vpop.permute.xlu1 %206  ;;  %v205_v53 = vpop.permute.xlu0 %204 }
  0xb9   :  { %v215_v54 = vmul.f32 %v3514_v49, %v207_v52  ;;  %v214_v55 = vmul.f32 %v3514_v49, %v205_v53  ;;  %2506 = vmatprep.subr.bf16.mxu0 %v403_v50 }
  0xbb   :  { %v395_v59 = vpack.c.bf16 %v215_v54, %v214_v55 }
  0xbc   :  { %v335_v60 = vpop.permute.xlu1 %334  ;;  %v333_v61 = vpop.permute.xlu0 %332 }
  0xbd   :  { %v343_v62 = vmul.f32 %v3526_v56, %v335_v60  ;;  %v342_v63 = vmul.f32 %v3526_v56, %v333_v61  ;;  %2507 = vmatpush3.bf16.msra.mxu0 %v395_v59  ;;  %v289_v59 = vmul.f32 %v3519_v51, %v3334_v6  ;;  %v3573_v6 = vld [vmem:[%s4251_s3 + $0x8] ss:$0 sm:$0xff]  ;;  %s2298_s3 = sshll.u32 %s3194_s16, 4  ;;  %s2299_s3 = int_to_ptr.vmem [resolvable:$true] %s2298_s3 }
  0xbe   :  { %s3139_s20 = scalar_lea.vmem %s2299_s3, 1024  ;;  %p3144_p1 = scmp.lt.s32.totalorder %s2299_s3, %s2299_s3 }
  0xbf   :  { %v419_v9 = vpack.c.bf16 %v343_v62, %v342_v63  ;;  %v2879_v63 = vld [vmem:[%s4253_s5] ss:$20 sps:$4 sm:$0xff]   ;;  %v408_v7 = vpack.c.bf16 %v289_v59, %v288_v58  ;;  %p3140_p0 = scmp.ne.s32.totalorder %s2299_s3, %s3139_s20  ;;  %p3145_p2 = scmp.lt.s32.totalorder %s3139_s20, %s3139_s20 }
  0xc0   :  { %v251_v11 = vpop.permute.xlu1 %250  ;;  %v249_v12 = vpop.permute.xlu0 %248  ;;  %v2902_v58 = vld [vmem:[%s4253_s5 + $0x80] ss:$20 sps:$4 sm:$0xff]  }
  0xc1   :  { %v261_v15 = vmul.f32 %v3507_v43, %v251_v11  ;;  %v260_v16 = vmul.f32 %v3507_v43, %v249_v12  ;;  %2618 = vmatprep.subr.bf16.mxu1 %v419_v9  ;;  %v2885_v11 = vld [vmem:[%s4253_s5 + $0x2c] ss:$20 sps:$4 sm:$0xff]   ;;  %p3146_p3 = por %p3145_p2, %p3144_p1 }
  0xc2   :  { %2619 = vmatpush3.bf16.msra.mxu1 %v411_v8 }
  0xc3   :  { %v402_v0 = vpack.c.bf16 %v261_v15, %v260_v16  ;;  %p3147_p4 = pnand %p3146_p3, %p3140_p0 }
  0xc4   :  { %v203_v1 = vpop.permute.xlu1 %202  ;;  %v201_v17 = vpop.permute.xlu0 %200 }
  0xc5   :  { %v213_v18 = vmul.f32 %v3514_v49, %v203_v1  ;;  %v212_v19 = vmul.f32 %v3514_v49, %v201_v17  ;;  %2508 = vmatprep.subr.bf16.mxu0 %v402_v0  ;;  %v2882_v0 = vld [vmem:[%s4253_s5 + $0x8] ss:$20 sps:$4 sm:$0xff]  }
  0xc6   :  { %v2888_v17 = vld [vmem:[%s4253_s5 + $0x34] ss:$20 sps:$4 sm:$0xff]  }
  0xc7   :  { %v394_v23 = vpack.c.bf16 %v213_v18, %v212_v19 }
  0xc8   :  { %v331_v24 = vpop.permute.xlu1 %330  ;;  %v329_v25 = vpop.permute.xlu0 %328 }
  0xc9   :  { %v341_v26 = vmul.f32 %v3526_v56, %v331_v24  ;;  %v340_v27 = vmul.f32 %v3526_v56, %v329_v25  ;;  %2509 = vmatpush3.bf16.msra.mxu0 %v394_v23  ;;  %v2891_v24 = vld [vmem:[%s4253_s5 + $0x54] ss:$20 sps:$4 sm:$0xff]  }
  0xcb   :  { %v418_v30 = vpack.c.bf16 %v341_v26, %v340_v27 }
  0xcc   :  { %v247_v31 = vpop.permute.xlu1 %246  ;;  %v245_v32 = vpop.permute.xlu0 %244 }
  0xcd   :  { %v259_v33 = vmul.f32 %v3507_v43, %v247_v31  ;;  %v258_v34 = vmul.f32 %v3507_v43, %v245_v32  ;;  %2620 = vmatprep.subr.bf16.mxu1 %v418_v30  ;;  %v2890_v32 = vld [vmem:[%s4253_s5 + $0x30] ss:$20 sps:$4 sm:$0xff]  }
  0xce   :  { %2621 = vmatpush3.bf16.msra.mxu1 %v410_v29 }
  0xcf   :  { %v401_v3 = vpack.c.bf16 %v259_v33, %v258_v34  ;;  %v2894_v34 = vld [vmem:[%s4253_s5 + $0x5c] ss:$20 sps:$4 sm:$0xff]  }
  0xd0   :  { %v199_v2 = vpop.permute.xlu1 %198  ;;  %v197_v35 = vpop.permute.xlu0 %196 }
  0xd1   :  { %v211_v36 = vmul.f32 %v3514_v49, %v199_v2  ;;  %v210_v37 = vmul.f32 %v3514_v49, %v197_v35  ;;  %2510 = vmatprep.subr.bf16.mxu0 %v401_v3 }
  0xd3   :  { %v393_v40 = vpack.c.bf16 %v211_v36, %v210_v37  ;;  %v142_v36 = vmul.f32 %v3519_v51, %v3418_v10  ;;  %v2896_v10 = vld [vmem:[%s4253_s5 + $0x58] ss:$20 sps:$4 sm:$0xff]  }
  0xd4   :  { %v327_v41 = vpop.permute.xlu1 %326  ;;  %v325_v42 = vpop.permute.xlu0 %324 }
  0xd5   :  { %v339_v44 = vmul.f32 %v3526_v56, %v327_v41  ;;  %v338_v45 = vmul.f32 %v3526_v56, %v325_v42  ;;  %2511 = vmatpush3.bf16.msra.mxu0 %v393_v40 }
  0xd7   :  { %v417_v47 = vpack.c.bf16 %v339_v44, %v338_v45  ;;  %v2900_v45 = vld [vmem:[%s4253_s5 + $0x84] ss:$20 sps:$4 sm:$0xff]  }
  0xd8   :  { %v243_v48 = vpop.permute.xlu1 %242  ;;  %v241_v50 = vpop.permute.xlu0 %240 }
  0xd9   :  { %v257_v52 = vmul.f32 %v3507_v43, %v243_v48  ;;  %v256_v53 = vmul.f32 %v3507_v43, %v241_v50  ;;  %2622 = vmatprep.subr.bf16.mxu1 %v417_v47  ;;  %v2903_v50 = vld [vmem:[%s4253_s5 + $0xa4] ss:$20 sps:$4 sm:$0xff]  }
  0xda   :  { %2623 = vmatpush3.bf16.msra.mxu1 %v409_v46  ;;  %v2899_v46 = vld [vmem:[%s4253_s5 + $0x78] ss:$20 sps:$4 sm:$0xff]  }
  0xdb   :  { %v400_v5 = vpack.c.bf16 %v257_v52, %v256_v53 }
  0xdc   :  { %v195_v4 = vpop.permute.xlu1 %194  ;;  %v193_v54 = vpop.permute.xlu0 %192 }
  0xdd   :  { %v209_v55 = vmul.f32 %v3514_v49, %v195_v4  ;;  %v208_v57 = vmul.f32 %v3514_v49, %v193_v54  ;;  %2512 = vmatprep.subr.bf16.mxu0 %v400_v5  ;;  %v3191_v4 = vmov 0   ;;  %v1789_v54 = vld [vmem:[%s4254_s6 + $0x38] sm:$0xff] }
  0xde   :  { %2878 = vset.pattern.permute.xlu1 %v3191_v4  ;;  %2877 = vset.pattern.permute.xlu0 %v3191_v4  ;;  %v1801_v4 = vld [vmem:[%s4254_s6 + $0x98] sm:$0xff] }
  0xdf   :  { %v392_v60 = vpack.c.bf16 %v209_v55, %v208_v57  ;;  %1851 = vperm.xlu1 %2878, %v1789_v54   ;;  %v2941_v54 = vld [vmem:[%s4253_s5 + $0x190] ss:$20 sps:$4 sm:$0xff]  }
  0xe0   :  { %v323_v61 = vpop.permute.xlu1 %322  ;;  %v321_v62 = vpop.permute.xlu0 %320 }
  0xe1   :  { %v337_v8 = vmul.f32 %v3526_v56, %v323_v61  ;;  %v336_v9 = vmul.f32 %v3526_v56, %v321_v62  ;;  %2513 = vmatpush3.bf16.msra.mxu0 %v392_v60  ;;  %v1796_v61 = vld [vmem:[%s4254_s6 + $0x70] sm:$0xff] }
  0xe2   :  { %v1788_v62 = vld [vmem:[%s4254_s6 + $0x30] sm:$0xff] }
  0xe3   :  { %v416_v12 = vpack.c.bf16 %v337_v8, %v336_v9  ;;  %1886 = vperm.xlu1 %2878, %v1796_v61   ;;  %1846 = vperm.xlu0 %2877, %v1788_v62   ;;  %v2947_v61 = vld [vmem:[%s4253_s5 + $0x1b8] ss:$20 sps:$4 sm:$0xff]  }
  0xe4   :  { %1038 = vmatmul.mubr.bf16.vlgmr.msra.gmra.mxu0 %v2879_v63  ;;  %v177_v15 = vpop.permute.xlu0 %176  ;;  %v381_v16 = vpop.permute.xlu1 %380  ;;  %v2905_v63 = vld [vmem:[%s4253_s5 + $0xa0] ss:$20 sps:$4 sm:$0xff]   ;;  %v2951_v62 = vld [vmem:[%s4253_s5 + $0x1e4] ss:$20 sps:$4 sm:$0xff]  }
  0xe5   :  { %2624 = vmatprep.subr.bf16.mxu1 %v416_v12  ;;  %1045 = vmatprep.mubr.bf16.mxu0 %v2885_v11  ;;  %v186_v1 = vmul.f32 %v3573_v6, %v177_v15  ;;  %v390_v19 = vmul.f32 %v3573_v6, %v381_v16  ;;  %v2909_v11 = vld [vmem:[%s4253_s5 + $0xcc] ss:$20 sps:$4 sm:$0xff]   ;;  %v1797_v16 = vld [vmem:[%s4254_s6 + $0x78] sm:$0xff] }
  0xe6   :  { %2625 = vmatpush3.bf16.msra.mxu1 %v408_v7  ;;  %v1786_v15 = vld [vmem:[%s4254_s6 + $0x20] sm:$0xff] }
  0xe7   :  { %v191_v18 = vpack.c.bf16 %v186_v1, %v186_v1  ;;  %1836 = vperm.xlu1 %2878, %v1786_v15   ;;  %1891 = vperm.xlu0 %2877, %v1797_v16   ;;  %v1794_v1 = vld [vmem:[%s4254_s6 + $0x60] sm:$0xff]  ;;  %v2960_v15 = vld [vmem:[%s4253_s5 + $0x214] ss:$20 sps:$4 sm:$0xff]  }
  0xe8   :  { %v383_v22 = vpop.permute.xlu0 %382  ;;  %v155_v23 = vpop.permute.xlu1 %154  ;;  %v2959_v16 = vld [vmem:[%s4253_s5 + $0x208] ss:$20 sps:$4 sm:$0xff]  }
  0xe9   :  { %1199 = vmatmul.mubr.bf16.vlgmr.msra.gmra.mxu1 %v2882_v0  ;;  %v1619_v25 = vsel %vm1617_vm0, %v191_v18, 0  ;;  %v391_v26 = vmul.f32 %v3573_v6, %v383_v22  ;;  %2862 = vmatprep.subr.msk.bf16.mxu1 %vm1617_vm0, %v191_v18  ;;  %v164_v29 = vmul.f32 %v3526_v56, %v155_v23  ;;  %v2893_v56 = vld [vmem:[%s4253_s5 + $0x50] ss:$20 sps:$4 sm:$0xff]   ;;  %v2911_v18 = vld [vmem:[%s4253_s5 + $0xc8] ss:$20 sps:$4 sm:$0xff]  }
  0xea   :  { %1206 = vmatprep.mubr.bf16.mxu1 %v2888_v17  ;;  %2809 = vmatpush3.bf16.msra.mxu1 %v1619_v25  ;;  %v1787_v17 = vld [vmem:[%s4254_s6 + $0x28] sm:$0xff]  ;;  %v2914_v23 = vld [vmem:[%s4253_s5 + $0xd0] ss:$20 sps:$4 sm:$0xff]  }
  0xeb   :  { %v427_v27 = vpack.c.bf16 %v391_v26, %v390_v19  ;;  %1876 = vperm.xlu1 %2878, %v1794_v1   ;;  %v2915_v19 = vld [vmem:[%s4253_s5 + $0xf4] ss:$20 sps:$4 sm:$0xff]   ;;  %1841 = vperm.xlu0 %2877, %v1787_v17   ;;  %v1785_v26 = vld [vmem:[%s4254_s6 + $0x18] sm:$0xff]  ;;  %v2965_v1 = vld [vmem:[%s4253_s5 + $0x230] ss:$20 sps:$4 sm:$0xff]  }
  0xec   :  { %1046 = vmatmul.mubr.bf16.gmra.mxu0 %v2887_v20  ;;  %v166_v30 = vpop.permute.xlu0 %165  ;;  %v377_v31 = vpop.permute.xlu1 %376  ;;  %v1784_v20 = vld [vmem:[%s4254_s6 + $0x10] sm:$0xff]  ;;  %v1795_v22 = vld [vmem:[%s4254_s6 + $0x68] sm:$0xff] }
  0xed   :  { %1053 = vmatprep.mubr.bf16.mxu0 %v2891_v24  ;;  %2768 = vmatprep.subr.bf16.mxu0 %v427_v27  ;;  %v175_v33 = vmul.f32 %v3445_v21, %v166_v30  ;;  %v388_v2 = vmul.f32 %v3573_v6, %v377_v31  ;;  %v2897_v21 = vld [vmem:[%s4253_s5 + $0x7c] ss:$20 sps:$4 sm:$0xff]   ;;  %v1782_v30 = vld [vmem:[%s4254_s6] sm:$0xff] }
  0xee   :  { %2769 = vmatpush3.bf16.msra.mxu0 %v427_v27  ;;  %v2918_v24 = vld [vmem:[%s4253_s5 + $0xfc] ss:$20 sps:$4 sm:$0xff]  }
  0xef   :  { %v190_v3 = vpack.c.bf16 %v175_v33, %v164_v29  ;;  %1826 = vperm.xlu1 %2878, %v1784_v20   ;;  %1881 = vperm.xlu0 %2877, %v1795_v22   ;;  %v1792_v25 = vld [vmem:[%s4254_s6 + $0x50] sm:$0xff]  ;;  %v1793_v31 = vld [vmem:[%s4254_s6 + $0x58] sm:$0xff] }
  0xf0   :  { %v379_v35 = vpop.permute.xlu0 %378  ;;  %v2917_v27 = vld [vmem:[%s4253_s5 + $0xf0] ss:$20 sps:$4 sm:$0xff]   ;;  %v2971_v20 = vld [vmem:[%s4253_s5 + $0x258] ss:$20 sps:$4 sm:$0xff]  }
  0xf1   :  { %1207 = vmatmul.mubr.bf16.gmra.mxu1 %v2890_v32  ;;  %v389_v37 = vmul.f32 %v3573_v6, %v379_v35  ;;  %2810 = vmatprep.subr.bf16.mxu1 %v190_v3  ;;  %v144_v38 = vpop.permute.xlu1 %143  ;;  %v2921_v29 = vld [vmem:[%s4253_s5 + $0x11c] ss:$20 sps:$4 sm:$0xff]   ;;  %v2920_v32 = vld [vmem:[%s4253_s5 + $0xf8] ss:$20 sps:$4 sm:$0xff]  }
  0xf2   :  { %1214 = vmatprep.mubr.bf16.mxu1 %v2894_v34  ;;  %2811 = vmatpush3.bf16.msra.mxu1 %v190_v3  ;;  %v153_v39 = vmul.f32 %v3456_v28, %v144_v38  ;;  %v2924_v33 = vld [vmem:[%s4253_s5 + $0x124] ss:$20 sps:$4 sm:$0xff]   ;;  %v1783_v3 = vld [vmem:[%s4254_s6 + $0x8] sm:$0xff]  ;;  %v1804_v35 = vld [vmem:[%s4254_s6 + $0xb0] sm:$0xff] }
  0xf3   :  { %v426_v40 = vpack.c.bf16 %v389_v37, %v388_v2  ;;  %1866 = vperm.xlu1 %2878, %v1792_v25   ;;  %1831 = vperm.xlu0 %2877, %v1785_v26   ;;  %v1790_v34 = vld [vmem:[%s4254_s6 + $0x40] sm:$0xff]  ;;  %v2923_v2 = vld [vmem:[%s4253_s5 + $0x118] ss:$20 sps:$4 sm:$0xff]   ;;  %v1812_v38 = vld [vmem:[%s4254_s6 + $0xf0] sm:$0xff] }
  0xf4   :  { %1054 = vmatmul.mubr.bf16.gmra.mxu0 %v2893_v56  ;;  %v189_v41 = vpack.c.bf16 %v153_v39, %v142_v36  ;;  %v373_v42 = vpop.permute.xlu0 %372  ;;  %v2927_v56 = vld [vmem:[%s4253_s5 + $0x144] ss:$20 sps:$4 sm:$0xff]   ;;  %v1791_v36 = vld [vmem:[%s4254_s6 + $0x48] sm:$0xff]  ;;  %v2969_v17 = vld [vmem:[%s4253_s5 + $0x25c] ss:$20 sps:$4 sm:$0xff]  }
  0xf5   :  { %1061 = vmatprep.mubr.bf16.mxu0 %v2897_v21  ;;  %2770 = vmatprep.subr.bf16.mxu0 %v426_v40  ;;  %v375_v51 = vpop.permute.xlu1 %374  ;;  %v386_v44 = vmul.f32 %v3573_v6, %v373_v42  ;;  %v2926_v21 = vld [vmem:[%s4253_s5 + $0x120] ss:$20 sps:$4 sm:$0xff]   ;;  %v1805_v39 = vld [vmem:[%s4254_s6 + $0xb8] sm:$0xff]  ;;  %v2975_v22 = vld [vmem:[%s4253_s5 + $0x10] ss:$20 sps:$4 sm:$0xff]  }
  0xf6   :  { %2771 = vmatpush3.bf16.msra.mxu0 %v426_v40  ;;  %2812 = vmatprep.subr.bf16.mxu1 %v189_v41  ;;  %v387_v28 = vmul.f32 %v3573_v6, %v375_v51  ;;  %v2930_v37 = vld [vmem:[%s4253_s5 + $0x14c] ss:$20 sps:$4 sm:$0xff]   ;;  %v2932_v51 = vld [vmem:[%s4253_s5 + $0x148] ss:$20 sps:$4 sm:$0xff]  }
  0xf7   :  { %2813 = vmatpush3.bf16.msra.mxu1 %v189_v41  ;;  %1816 = vperm.xlu1 %2878, %v1782_v30   ;;  %v2929_v40 = vld [vmem:[%s4253_s5 + $0x140] ss:$20 sps:$4 sm:$0xff]   ;;  %v2976_v25 = vld [vmem:[%s4253_s5 + $0x38] ss:$20 sps:$4 sm:$0xff]   ;;  %v2980_v30 = vld [vmem:[%s4253_s5 + $0x88] ss:$20 sps:$4 sm:$0xff]  }
  0xf8   :  { %v425_v47 = vpack.c.bf16 %v387_v28, %v386_v44  ;;  %v113_v48 = vpop.permute.xlu0 %112  ;;  %1871 = vperm.xlu0 %2877, %v1793_v31   ;;  %v2933_v41 = vld [vmem:[%s4253_s5 + $0x16c] ss:$20 sps:$4 sm:$0xff]   ;;  %v2936_v44 = vld [vmem:[%s4253_s5 + $0x174] ss:$20 sps:$4 sm:$0xff]   ;;  %v2983_v31 = vld [vmem:[%s4253_s5 + $0xb0] ss:$20 sps:$4 sm:$0xff]  }
  0xf9   :  { %1215 = vmatmul.mubr.bf16.gmra.mxu1 %v2896_v10  ;;  %v124_v52 = vpop.permute.xlu1 %123  ;;  %v122_v53 = vmul.f32 %v3507_v43, %v113_v48  ;;  %v1802_v42 = vld [vmem:[%s4254_s6 + $0xa0] sm:$0xff]  ;;  %v1813_v10 = vld [vmem:[%s4254_s6 + $0xf8] sm:$0xff]  ;;  %v1803_v28 = vld [vmem:[%s4254_s6 + $0xa8] sm:$0xff] }
  0xfa   :  { %1222 = vmatprep.mubr.bf16.mxu1 %v2900_v45  ;;  %2772 = vmatprep.subr.bf16.mxu0 %v425_v47  ;;  %v133_v5 = vmul.f32 %v3432_v14, %v124_v52  ;;  %v2906_v14 = vld [vmem:[%s4253_s5 + $0xac] ss:$20 sps:$4 sm:$0xff]   ;;  %v1800_v48 = vld [vmem:[%s4254_s6 + $0x90] sm:$0xff] }
  0xfb   :  { %2773 = vmatpush3.bf16.msra.mxu0 %v425_v47  ;;  %1856 = vperm.xlu1 %2878, %v1790_v34   ;;  %v1810_v45 = vld [vmem:[%s4254_s6 + $0xe0] sm:$0xff]  ;;  %v2939_v47 = vld [vmem:[%s4253_s5 + $0x194] ss:$20 sps:$4 sm:$0xff]   ;;  %v2984_v34 = vld [vmem:[%s4253_s5 + $0xd8] ss:$20 sps:$4 sm:$0xff]  }
  0xfc   :  { %1062 = vmatmul.mubr.bf16.gmra.mxu0 %v2899_v46  ;;  %v188_v55 = vpack.c.bf16 %v133_v5, %v122_v53  ;;  %v369_v57 = vpop.permute.xlu0 %368  ;;  %1821 = vperm.xlu0 %2877, %v1783_v3   ;;  %v2935_v46 = vld [vmem:[%s4253_s5 + $0x168] ss:$20 sps:$4 sm:$0xff]   ;;  %v2938_v52 = vld [vmem:[%s4253_s5 + $0x170] ss:$20 sps:$4 sm:$0xff]   ;;  %v2979_v26 = vld [vmem:[%s4253_s5 + $0x60] ss:$20 sps:$4 sm:$0xff]  }
  0xfd   :  { %1069 = vmatprep.mubr.bf16.mxu0 %v2903_v50  ;;  %v371_v43 = vpop.permute.xlu1 %370  ;;  %v384_v59 = vmul.f32 %v3573_v6, %v369_v57  ;;  %v1811_v50 = vld [vmem:[%s4254_s6 + $0xe8] sm:$0xff]  ;;  %v2942_v53 = vld [vmem:[%s4253_s5 + $0x19c] ss:$20 sps:$4 sm:$0xff]   ;;  %v1798_v57 = vld [vmem:[%s4254_s6 + $0x80] sm:$0xff] }
  0xfe   :  { %v385_v60 = vmul.f32 %v3573_v6, %v371_v43  ;;  %2814 = vmatprep.subr.bf16.mxu1 %v188_v55  ;;  %v1808_v5 = vld [vmem:[%s4254_s6 + $0xd0] sm:$0xff]  ;;  %v2944_v43 = vld [vmem:[%s4253_s5 + $0x198] ss:$20 sps:$4 sm:$0xff]  }
  0xff   :  { %2815 = vmatpush3.bf16.msra.mxu1 %v188_v55  ;;  %1926 = vperm.xlu1 %2878, %v1804_v35   ;;  %v2945_v55 = vld [vmem:[%s4253_s5 + $0x1bc] ss:$20 sps:$4 sm:$0xff]   ;;  %v2987_v3 = vld [vmem:[%s4253_s5 + $0x100] ss:$20 sps:$4 sm:$0xff]  }
 0x100   :  { %v424_v8 = vpack.c.bf16 %v385_v60, %v384_v59  ;;  %v92_v9 = vpop.permute.xlu0 %91  ;;  %1861 = vperm.xlu0 %2877, %v1791_v36   ;;  %v2948_v59 = vld [vmem:[%s4253_s5 + $0x1c4] ss:$20 sps:$4 sm:$0xff]   ;;  %v1799_v60 = vld [vmem:[%s4254_s6 + $0x88] sm:$0xff] }
 0x101   :  { %1223 = vmatmul.mubr.bf16.gmra.mxu1 %v2902_v58  ;;  %v102_v7 = vpop.permute.xlu1 %101  ;;  %v100_v6 = vmul.f32 %v3514_v49, %v92_v9  ;;  %v2908_v49 = vld [vmem:[%s4253_s5 + $0xa8] ss:$20 sps:$4 sm:$0xff]   ;;  %v2950_v9 = vld [vmem:[%s4253_s5 + $0x1c0] ss:$20 sps:$4 sm:$0xff]   ;;  %v2991_v36 = vld [vmem:[%s4253_s5 + $0x150] ss:$20 sps:$4 sm:$0xff]  }
 0x102   :  { %1230 = vmatprep.mubr.bf16.mxu1 %v2906_v14  ;;  %v111_v12 = vmul.f32 %v3427_v13, %v102_v7  ;;  %2774 = vmatprep.subr.bf16.mxu0 %v424_v8  ;;  %v2912_v13 = vld [vmem:[%s4253_s5 + $0xd4] ss:$20 sps:$4 sm:$0xff]   ;;  %v1809_v58 = vld [vmem:[%s4254_s6 + $0xd8] sm:$0xff]  ;;  %v1806_v14 = vld [vmem:[%s4254_s6 + $0xc0] sm:$0xff] }
 0x103   :  { %2775 = vmatpush3.bf16.msra.mxu0 %v424_v8  ;;  %1966 = vperm.xlu1 %2878, %v1812_v38   ;;  %v1807_v8 = vld [vmem:[%s4254_s6 + $0xc8] sm:$0xff]  ;;  %v2953_v7 = vld [vmem:[%s4253_s5 + $0x1e0] ss:$20 sps:$4 sm:$0xff]  }
 0x104   :  { %1070 = vmatmul.mubr.bf16.gmra.mxu0 %v2905_v63  ;;  %v187_v0 = vpack.c.bf16 %v111_v12, %v100_v6  ;;  %1931 = vperm.xlu0 %2877, %v1805_v39   ;;  %v2235_v63 = vld [vmem:[%s4256_s8] sm:$0x7]  ;;  %v2956_v12 = vld [vmem:[%s4253_s5 + $0x1e8] ss:$20 sps:$4 sm:$0xff]   ;;  %v2992_v38 = vld [vmem:[%s4253_s5 + $0x178] ss:$20 sps:$4 sm:$0xff]  }
 0x105   :  { %1077 = vmatprep.mubr.bf16.mxu0 %v2909_v11  ;;  %v2954_v11 = vld [vmem:[%s4253_s5 + $0x1ec] ss:$20 sps:$4 sm:$0xff]   ;;  %v2988_v35 = vld [vmem:[%s4253_s5 + $0x128] ss:$20 sps:$4 sm:$0xff]  }
 0x106   :  { %2816 = vmatprep.subr.bf16.mxu1 %v187_v0  ;;  %v2957_v6 = vld [vmem:[%s4253_s5 + $0x20c] ss:$20 sps:$4 sm:$0xff]  }
 0x107   :  { %2817 = vmatpush3.bf16.msra.mxu1 %v187_v0  ;;  %1916 = vperm.xlu1 %2878, %v1802_v42   ;;  %v2963_v0 = vld [vmem:[%s4253_s5 + $0x234] ss:$20 sps:$4 sm:$0xff]  }
 0x108   :  { %1971 = vperm.xlu0 %2877, %v1813_v10   ;;  %v2995_v39 = vld [vmem:[%s4253_s5 + $0x1a0] ss:$20 sps:$4 sm:$0xff]   ;;  %v2996_v42 = vld [vmem:[%s4253_s5 + $0x1c8] ss:$20 sps:$4 sm:$0xff]   ;;  %v2999_v10 = vld [vmem:[%s4253_s5 + $0x1f0] ss:$20 sps:$4 sm:$0xff]  }
 0x109   :  { %1231 = vmatmul.mubr.bf16.gmra.mxu1 %v2908_v49  ;;  %v2962_v49 = vld [vmem:[%s4253_s5 + $0x210] ss:$20 sps:$4 sm:$0xff]  }
 0x10a   :  { %1238 = vmatprep.mubr.bf16.mxu1 %v2912_v13  ;;  %v2966_v13 = vld [vmem:[%s4253_s5 + $0x23c] ss:$20 sps:$4 sm:$0xff]  }
 0x10b   :  { %1956 = vperm.xlu1 %2878, %v1810_v45   ;;  %v3000_v45 = vld [vmem:[%s4253_s5 + $0x218] ss:$20 sps:$4 sm:$0xff]  }
 0x10c   :  { %1078 = vmatmul.mubr.bf16.gmra.mxu0 %v2911_v18  ;;  %1921 = vperm.xlu0 %2877, %v1803_v28   ;;  %v2968_v18 = vld [vmem:[%s4253_s5 + $0x238] ss:$20 sps:$4 sm:$0xff]   ;;  %v3003_v28 = vld [vmem:[%s4253_s5 + $0x240] ss:$20 sps:$4 sm:$0xff]  }
 0x10d   :  { %1085 = vmatprep.mubr.bf16.mxu0 %v2915_v19  ;;  %v2972_v19 = vld [vmem:[%s4253_s5 + $0x264] ss:$20 sps:$4 sm:$0xff]  }
 0x10f   :  { %1906 = vperm.xlu1 %2878, %v1800_v48   ;;  %v3004_v48 = vld [vmem:[%s4253_s5 + $0x268] ss:$20 sps:$4 sm:$0xff]  }
 0x110   :  { %1961 = vperm.xlu0 %2877, %v1811_v50   ;;  %v3006_v50 = vld [vmem:[%s4252_s4 + $0x78] sm:$0xff]  }
 0x111   :  { %1239 = vmatmul.mubr.bf16.gmra.mxu1 %v2914_v23  ;;  %v2974_v23 = vld [vmem:[%s4253_s5 + $0x260] ss:$20 sps:$4 sm:$0xff]  }
 0x112   :  { %1246 = vmatprep.mubr.bf16.mxu1 %v2918_v24  ;;  %v2977_v24 = vld [vmem:[%s4252_s4] sm:$0xff]  }
 0x113   :  { %1946 = vperm.xlu1 %2878, %v1808_v5  }
 0x114   :  { %1086 = vmatmul.mubr.bf16.gmra.mxu0 %v2917_v27  ;;  %1911 = vperm.xlu0 %2877, %v1801_v4   ;;  %v2978_v27 = vld [vmem:[%s4252_s4 + $0x8] sm:$0xff]  }
 0x115   :  { %1093 = vmatprep.mubr.bf16.mxu0 %v2921_v29  ;;  %v2981_v29 = vld [vmem:[%s4252_s4 + $0x10] sm:$0xff]  }
 0x117   :  { %1896 = vperm.xlu1 %2878, %v1798_v57  }
 0x118   :  { %1951 = vperm.xlu0 %2877, %v1809_v58  }
 0x119   :  { %1247 = vmatmul.mubr.bf16.gmra.mxu1 %v2920_v32  ;;  %v2982_v32 = vld [vmem:[%s4252_s4 + $0x18] sm:$0xff]  }
 0x11a   :  { %1254 = vmatprep.mubr.bf16.mxu1 %v2924_v33  ;;  %v2985_v33 = vld [vmem:[%s4252_s4 + $0x20] sm:$0xff]  }
 0x11b   :  { %1936 = vperm.xlu1 %2878, %v1806_v14  }
 0x11c   :  { %1094 = vmatmul.mubr.bf16.gmra.mxu0 %v2923_v2  ;;  %1901 = vperm.xlu0 %2877, %v1799_v60   ;;  %v2986_v2 = vld [vmem:[%s4252_s4 + $0x28] sm:$0xff]  }
 0x11d   :  { %1101 = vmatprep.mubr.bf16.mxu0 %v2927_v56  ;;  %v2989_v56 = vld [vmem:[%s4252_s4 + $0x30] sm:$0xff]  }
 0x11f   :  { %2238 = vperm.xlu1 %2878, %v2235_v63  }
 0x120   :  { %1941 = vperm.xlu0 %2877, %v1807_v8  }
 0x121   :  { %1255 = vmatmul.mubr.bf16.gmra.mxu1 %v2926_v21  ;;  %v2990_v21 = vld [vmem:[%s4252_s4 + $0x38] sm:$0xff]  }
 0x122   :  { %1262 = vmatprep.mubr.bf16.mxu1 %v2930_v37  ;;  %v2993_v37 = vld [vmem:[%s4252_s4 + $0x40] sm:$0xff]  }
 0x124   :  { %1102 = vmatmul.mubr.bf16.gmra.mxu0 %v2929_v40  ;;  %v2994_v40 = vld [vmem:[%s4252_s4 + $0x48] sm:$0xff]  }
 0x125   :  { %1109 = vmatprep.mubr.bf16.mxu0 %v2933_v41  ;;  %v2997_v41 = vld [vmem:[%s4252_s4 + $0x50] sm:$0xff]  }
 0x129   :  { %1263 = vmatmul.mubr.bf16.gmra.mxu1 %v2932_v51  ;;  %v2998_v51 = vld [vmem:[%s4252_s4 + $0x58] sm:$0xff]  }
 0x12a   :  { %1270 = vmatprep.mubr.bf16.mxu1 %v2936_v44  ;;  %v3001_v44 = vld [vmem:[%s4252_s4 + $0x60] sm:$0xff]  }
 0x12c   :  { %1110 = vmatmul.mubr.bf16.gmra.mxu0 %v2935_v46  ;;  %v3002_v46 = vld [vmem:[%s4252_s4 + $0x68] sm:$0xff]  }
 0x12d   :  { %1117 = vmatprep.mubr.bf16.mxu0 %v2939_v47  ;;  %v3005_v47 = vld [vmem:[%s4252_s4 + $0x70] sm:$0xff]  }
 0x131   :  { %1271 = vmatmul.mubr.bf16.gmra.mxu1 %v2938_v52 }
 0x132   :  { %1278 = vmatprep.mubr.bf16.mxu1 %v2942_v53 }
 0x134   :  { %1118 = vmatmul.mubr.bf16.gmra.mxu0 %v2941_v54 }
 0x135   :  { %1125 = vmatprep.mubr.bf16.mxu0 %v2945_v55 }
 0x139   :  { %1279 = vmatmul.mubr.bf16.gmra.mxu1 %v2944_v43 }
 0x13a   :  { %1286 = vmatprep.mubr.bf16.mxu1 %v2948_v59 }
 0x13c   :  { %1126 = vmatmul.mubr.bf16.gmra.mxu0 %v2947_v61 }
 0x13d   :  { %1133 = vmatprep.mubr.bf16.mxu0 %v2951_v62 }
 0x141   :  { %1287 = vmatmul.mubr.bf16.gmra.mxu1 %v2950_v9 }
 0x142   :  { %1294 = vmatprep.mubr.bf16.mxu1 %v2954_v11 }
 0x144   :  { %1134 = vmatmul.mubr.bf16.gmra.mxu0 %v2953_v7 }
 0x145   :  { %1141 = vmatprep.mubr.bf16.mxu0 %v2957_v6 }
 0x149   :  { %1295 = vmatmul.mubr.bf16.gmra.mxu1 %v2956_v12 }
 0x14a   :  { %1302 = vmatprep.mubr.bf16.mxu1 %v2960_v15 }
 0x14c   :  { %1142 = vmatmul.mubr.bf16.gmra.mxu0 %v2959_v16 }
 0x14d   :  { %1149 = vmatprep.mubr.bf16.mxu0 %v2963_v0 }
 0x151   :  { %1303 = vmatmul.mubr.bf16.gmra.mxu1 %v2962_v49 }
 0x152   :  { %1310 = vmatprep.mubr.bf16.mxu1 %v2966_v13 }
 0x154   :  { %1150 = vmatmul.mubr.bf16.gmra.mxu0 %v2965_v1 }
 0x155   :  { %1157 = vmatprep.mubr.bf16.mxu0 %v2969_v17 }
 0x159   :  { %1311 = vmatmul.mubr.bf16.gmra.mxu1 %v2968_v18 }
 0x15a   :  { %1318 = vmatprep.mubr.bf16.mxu1 %v2972_v19 }
 0x15c   :  { %1158 = vmatmul.mubr.bf16.gmra.mxu0 %v2971_v20 }
 0x15d   :  { %2776 = vmatprep.mubr.msk.bf16.mxu0 %vm956_vm1, %v2975_v22 }
 0x161   :  { %1319 = vmatmul.mubr.bf16.gmra.mxu1 %v2974_v23 }
 0x162   :  { %2818 = vmatprep.mubr.msk.bf16.mxu1 %vm1568_vm2, %v2977_v24 }
 0x164   :  { %2777 = vmatmul.mubr.msk.bf16.vlgmr.msra.gmra.mxu0 %vm956_vm1, %v2976_v25 }
 0x165   :  { %2780 = vmatprep.mubr.msk.bf16.mxu0 %vm956_vm1, %v2979_v26 }
 0x169   :  { %2819 = vmatmul.mubr.msk.bf16.vlgmr.msra.gmra.mxu1 %vm1568_vm2, %v2978_v27 }
 0x16a   :  { %2822 = vmatprep.mubr.msk.bf16.mxu1 %vm1568_vm2, %v2981_v29 }
 0x16c   :  { %2781 = vmatmul.mubr.msk.bf16.gmra.mxu0 %vm956_vm1, %v2980_v30 }
 0x16d   :  { %2784 = vmatprep.mubr.msk.bf16.mxu0 %vm956_vm1, %v2983_v31 }
 0x171   :  { %2823 = vmatmul.mubr.msk.bf16.gmra.mxu1 %vm1568_vm2, %v2982_v32 }
 0x172   :  { %2826 = vmatprep.mubr.msk.bf16.mxu1 %vm1568_vm2, %v2985_v33 }
 0x174   :  { %2785 = vmatmul.mubr.msk.bf16.gmra.mxu0 %vm956_vm1, %v2984_v34 }
 0x175   :  { %2788 = vmatprep.mubr.msk.bf16.mxu0 %vm956_vm1, %v2987_v3 }
 0x179   :  { %2827 = vmatmul.mubr.msk.bf16.gmra.mxu1 %vm1568_vm2, %v2986_v2 }
 0x17a   :  { %2830 = vmatprep.mubr.msk.bf16.mxu1 %vm1568_vm2, %v2989_v56 }
 0x17c   :  { %2789 = vmatmul.mubr.msk.bf16.gmra.mxu0 %vm956_vm1, %v2988_v35 }
 0x17d   :  { %2792 = vmatprep.mubr.msk.bf16.mxu0 %vm956_vm1, %v2991_v36 }
 0x181   :  { %2831 = vmatmul.mubr.msk.bf16.gmra.mxu1 %vm1568_vm2, %v2990_v21 }
 0x182   :  { %2834 = vmatprep.mubr.msk.bf16.mxu1 %vm1568_vm2, %v2993_v37 }
 0x184   :  { %2793 = vmatmul.mubr.msk.bf16.gmra.mxu0 %vm956_vm1, %v2992_v38 }
 0x185   :  { %2796 = vmatprep.mubr.msk.bf16.mxu0 %vm956_vm1, %v2995_v39 }
 0x189   :  { %2835 = vmatmul.mubr.msk.bf16.gmra.mxu1 %vm1568_vm2, %v2994_v40 }
 0x18a   :  { %2838 = vmatprep.mubr.msk.bf16.mxu1 %vm1568_vm2, %v2997_v41 }
 0x18c   :  { %2797 = vmatmul.mubr.msk.bf16.gmra.mxu0 %vm956_vm1, %v2996_v42 }
 0x18d   :  { %2800 = vmatprep.mubr.msk.bf16.mxu0 %vm956_vm1, %v2999_v10 }
 0x191   :  { %2839 = vmatmul.mubr.msk.bf16.gmra.mxu1 %vm1568_vm2, %v2998_v51 }
 0x192   :  { %2842 = vmatprep.mubr.msk.bf16.mxu1 %vm1568_vm2, %v3001_v44 }
 0x194   :  { %2801 = vmatmul.mubr.msk.bf16.gmra.mxu0 %vm956_vm1, %v3000_v45 }
 0x195   :  { %2804 = vmatprep.mubr.msk.bf16.mxu0 %vm956_vm1, %v3003_v28 }
 0x199   :  { %2843 = vmatmul.mubr.msk.bf16.gmra.mxu1 %vm1568_vm2, %v3002_v46 }
 0x19a   :  { %2846 = vmatprep.mubr.msk.bf16.mxu1 %vm1568_vm2, %v3005_v47 }
 0x19c   :  { %2805 = vmatmul.mubr.msk.bf16.gmra.mxu0 %vm956_vm1, %v3004_v48 }
 0x1a1   :  { %2847 = vmatmul.mubr.msk.bf16.gmra.mxu1 %vm1568_vm2, %v3006_v50 }
 0x1a4   :  { %v2514_v52 = vpop.f32.mrf.mxu0 }
 0x1a6   :  { %v2515_v53 = vpop.f32.mrf.mxu0 }
 0x1a7   :  { %v2516_v5 = vadd.f32 %v2515_v53, %v2514_v52 }
 0x1a8   :  { %v2517_v4 = vpop.f32.mrf.mxu0 }
 0x1a9   :  { %v2626_v54 = vpop.f32.mrf.mxu1 }
 0x1aa   :  { %v2518_v55 = vpop.f32.mrf.mxu0 }
 0x1ab   :  { %v2519_v57 = vadd.f32 %v2518_v55, %v2517_v4  ;;  %v2627_v58 = vpop.f32.mrf.mxu1 }
 0x1ac   :  { %v2628_v43 = vadd.f32 %v2627_v58, %v2626_v54  ;;  %v2520_v59 = vpop.f32.mrf.mxu0 }
 0x1ad   :  { %v2629_v14 = vpop.f32.mrf.mxu1 }
 0x1ae   :  { %v2521_v60 = vpop.f32.mrf.mxu0  ;;  %v4000_v61 = vadd.f32 %v2628_v43, %v2516_v5 }
 0x1af   :  { %v2522_v62 = vadd.f32 %v2521_v60, %v2520_v59  ;;  %v2630_v63 = vpop.f32.mrf.mxu1 }
 0x1b0   :  { %v2631_v8 = vadd.f32 %v2630_v63, %v2629_v14  ;;  %v2523_v9 = vpop.f32.mrf.mxu0 }
 0x1b1   :  { %v2632_v11 = vpop.f32.mrf.mxu1 }
 0x1b2   :  { %v2524_v7 = vpop.f32.mrf.mxu0  ;;  %v4002_v6 = vadd.f32 %v2631_v8, %v2519_v57 }
 0x1b3   :  { %v2525_v12 = vadd.f32 %v2524_v7, %v2523_v9  ;;  %v2633_v15 = vpop.f32.mrf.mxu1 }
 0x1b4   :  { %v2634_v16 = vadd.f32 %v2633_v15, %v2632_v11  ;;  %v2526_v0 = vpop.f32.mrf.mxu0 }
 0x1b5   :  { %v2635_v49 = vpop.f32.mrf.mxu1 }
 0x1b6   :  { %v2527_v13 = vpop.f32.mrf.mxu0  ;;  %v4004_v1 = vadd.f32 %v2634_v16, %v2522_v62 }
 0x1b7   :  { %v2528_v17 = vadd.f32 %v2527_v13, %v2526_v0  ;;  %v2636_v18 = vpop.f32.mrf.mxu1 }
 0x1b8   :  { %v2637_v19 = vadd.f32 %v2636_v18, %v2635_v49  ;;  %v2529_v20 = vpop.f32.mrf.mxu0 }
 0x1b9   :  { %v2638_v22 = vpop.f32.mrf.mxu1 }
 0x1ba   :  { %v2530_v23 = vpop.f32.mrf.mxu0  ;;  %v4006_v24 = vadd.f32 %v2637_v19, %v2525_v12 }
 0x1bb   :  { %v2531_v25 = vadd.f32 %v2530_v23, %v2529_v20  ;;  %v2639_v26 = vpop.f32.mrf.mxu1 }
 0x1bc   :  { %v2640_v27 = vadd.f32 %v2639_v26, %v2638_v22  ;;  %v2532_v29 = vpop.f32.mrf.mxu0 }
 0x1bd   :  { %v2641_v30 = vpop.f32.mrf.mxu1 }
 0x1be   :  { %v2533_v31 = vpop.f32.mrf.mxu0  ;;  %v4008_v32 = vadd.f32 %v2640_v27, %v2528_v17 }
 0x1bf   :  { %v2534_v33 = vadd.f32 %v2533_v31, %v2532_v29  ;;  %v2642_v34 = vpop.f32.mrf.mxu1 }
 0x1c0   :  { %v2643_v3 = vadd.f32 %v2642_v34, %v2641_v30  ;;  %v2535_v2 = vpop.f32.mrf.mxu0 }
 0x1c1   :  { %v2644_v56 = vpop.f32.mrf.mxu1 }
 0x1c2   :  { %v2536_v35 = vpop.f32.mrf.mxu0  ;;  %v4010_v36 = vadd.f32 %v2643_v3, %v2531_v25 }
 0x1c3   :  { %v2537_v21 = vadd.f32 %v2536_v35, %v2535_v2  ;;  %v2645_v37 = vpop.f32.mrf.mxu1 }
 0x1c4   :  { %v2646_v38 = vadd.f32 %v2645_v37, %v2644_v56  ;;  %v2538_v39 = vpop.f32.mrf.mxu0 }
 0x1c5   :  { %v2647_v40 = vpop.f32.mrf.mxu1 }
 0x1c6   :  { %v2539_v41 = vpop.f32.mrf.mxu0  ;;  %v4012_v42 = vadd.f32 %v2646_v38, %v2534_v33 }
 0x1c7   :  { %v2540_v10 = vadd.f32 %v2539_v41, %v2538_v39  ;;  %v2648_v51 = vpop.f32.mrf.mxu1 }
 0x1c8   :  { %v2649_v44 = vadd.f32 %v2648_v51, %v2647_v40  ;;  %v2541_v45 = vpop.f32.mrf.mxu0 }
 0x1c9   :  { %v2650_v28 = vpop.f32.mrf.mxu1 }
 0x1ca   :  { %v2542_v46 = vpop.f32.mrf.mxu0  ;;  %v4014_v47 = vadd.f32 %v2649_v44, %v2537_v21 }
 0x1cb   :  { %v2543_v48 = vadd.f32 %v2542_v46, %v2541_v45  ;;  %v2651_v50 = vpop.f32.mrf.mxu1 }
 0x1cc   :  { %v2652_v52 = vadd.f32 %v2651_v50, %v2650_v28  ;;  %v2544_v53 = vpop.f32.mrf.mxu0 }
 0x1cd   :  { %v2653_v5 = vpop.f32.mrf.mxu1 }
 0x1ce   :  { %v2545_v4 = vpop.f32.mrf.mxu0  ;;  %v4016_v54 = vadd.f32 %v2652_v52, %v2540_v10 }
 0x1cf   :  { %v2546_v55 = vadd.f32 %v2545_v4, %v2544_v53  ;;  %v2654_v57 = vpop.f32.mrf.mxu1 }
 0x1d0   :  { %v2655_v58 = vadd.f32 %v2654_v57, %v2653_v5  ;;  %v2547_v43 = vpop.f32.mrf.mxu0 }
 0x1d1   :  { %v2656_v59 = vpop.f32.mrf.mxu1 }
 0x1d2   :  { %v2548_v14 = vpop.f32.mrf.mxu0  ;;  %v4018_v60 = vadd.f32 %v2655_v58, %v2543_v48 }
 0x1d3   :  { %v2549_v62 = vadd.f32 %v2548_v14, %v2547_v43  ;;  %v2657_v63 = vpop.f32.mrf.mxu1 }
 0x1d4   :  { %v2658_v8 = vadd.f32 %v2657_v63, %v2656_v59  ;;  %v2550_v9 = vpop.f32.mrf.mxu0 }
 0x1d5   :  { %v2659_v11 = vpop.f32.mrf.mxu1 }
 0x1d6   :  { %v2551_v7 = vpop.f32.mrf.mxu0  ;;  %v4020_v12 = vadd.f32 %v2658_v8, %v2546_v55 }
 0x1d7   :  { %v2552_v15 = vadd.f32 %v2551_v7, %v2550_v9  ;;  %v2660_v16 = vpop.f32.mrf.mxu1 }
 0x1d8   :  { %v2661_v0 = vadd.f32 %v2660_v16, %v2659_v11  ;;  %v2553_v49 = vpop.f32.mrf.mxu0 }
 0x1d9   :  { %v2662_v13 = vpop.f32.mrf.mxu1 }
 0x1da   :  { %v2554_v17 = vpop.f32.mrf.mxu0  ;;  %v4022_v18 = vadd.f32 %v2661_v0, %v2549_v62 }
 0x1db   :  { %v2555_v19 = vadd.f32 %v2554_v17, %v2553_v49  ;;  %v2663_v20 = vpop.f32.mrf.mxu1 }
 0x1dc   :  { %v2664_v22 = vadd.f32 %v2663_v20, %v2662_v13  ;;  %v2556_v23 = vpop.f32.mrf.mxu0 }
 0x1dd   :  { %v2665_v25 = vpop.f32.mrf.mxu1 }
 0x1de   :  { %v2557_v26 = vpop.f32.mrf.mxu0  ;;  %v4024_v27 = vadd.f32 %v2664_v22, %v2552_v15 }
 0x1df   :  { %v2558_v29 = vadd.f32 %v2557_v26, %v2556_v23  ;;  %v2666_v30 = vpop.f32.mrf.mxu1 }
 0x1e0   :  { %v2667_v31 = vadd.f32 %v2666_v30, %v2665_v25  ;;  %v2559_v33 = vpop.f32.mrf.mxu0 }
 0x1e1   :  { %v2668_v34 = vpop.f32.mrf.mxu1 }
 0x1e2   :  { %v2560_v3 = vpop.f32.mrf.mxu0  ;;  %v4026_v2 = vadd.f32 %v2667_v31, %v2555_v19 }
 0x1e3   :  { %v2561_v56 = vadd.f32 %v2560_v3, %v2559_v33  ;;  %v2669_v35 = vpop.f32.mrf.mxu1  ;;  %v4040_v33 = vpop.permute.xlu1 %1851 }
 0x1e4   :  { %v2670_v21 = vadd.f32 %v2669_v35, %v2668_v34  ;;  %v2562_v37 = vpop.f32.mrf.mxu0 }
 0x1e5   :  { %v2671_v38 = vpop.f32.mrf.mxu1 }
 0x1e6   :  { %v2563_v39 = vpop.f32.mrf.mxu0  ;;  %v4028_v40 = vadd.f32 %v2670_v21, %v2558_v29 }
 0x1e7   :  { %v2564_v41 = vadd.f32 %v2563_v39, %v2562_v37  ;;  %v2672_v10 = vpop.f32.mrf.mxu1  ;;  %v4044_v39 = vpop.permute.xlu0 %1846 }
 0x1e8   :  { %v2673_v51 = vadd.f32 %v2672_v10, %v2671_v38  ;;  %v2565_v44 = vpop.f32.mrf.mxu0 }
 0x1e9   :  { %v2674_v45 = vpop.f32.mrf.mxu1 }
 0x1ea   :  { %v2566_v28 = vpop.f32.mrf.mxu0  ;;  %v4030_v46 = vadd.f32 %v2673_v51, %v2561_v56  ;;  %v4260_v51 = vmov 0.0  }
 0x1eb   :  { %v2567_v48 = vadd.f32 %v2566_v28, %v2565_v44  ;;  %v2675_v50 = vpop.f32.mrf.mxu1  ;;  %2850 = vmatprep.subr.bf16.mxu0 %v4260_v51  ;;  %v4049_v28 = vpop.permute.xlu1 %1886  ;;  %2858 = vmatprep.mubr.msk.bf16.mxu0 %vm3193_vm3, %v4260_v51 }
 0x1ec   :  { %v2676_v52 = vadd.f32 %v2675_v50, %v2674_v45  ;;  %v2568_v53 = vpop.f32.mrf.mxu0 }
 0x1ed   :  { %v2677_v5 = vpop.f32.mrf.mxu1 }
 0x1ee   :  { %v2569_v4 = vpop.f32.mrf.mxu0  ;;  %v4032_v55 = vadd.f32 %v2676_v52, %v2564_v41 }
 0x1ef   :  { %v2570_v57 = vadd.f32 %v2569_v4, %v2568_v53  ;;  %v2678_v58 = vpop.f32.mrf.mxu1 }
 0x1f0   :  { %v2679_v43 = vadd.f32 %v2678_v58, %v2677_v5  ;;  %v2571_v59 = vpop.f32.mrf.mxu0  ;;  %v4053_v58 = vpop.permute.xlu0 %1891 }
 0x1f1   :  { %v2680_v14 = vpop.f32.mrf.mxu1 }
 0x1f2   :  { %v2572_v62 = vpop.f32.mrf.mxu0  ;;  %v4034_v63 = vadd.f32 %v2679_v43, %v2567_v48 }
 0x1f3   :  { %v2573_v8 = vadd.f32 %v2572_v62, %v2571_v59  ;;  %v2681_v9 = vpop.f32.mrf.mxu1  ;;  %v4055_v62 = vpop.permute.xlu1 %1836 }
 0x1f4   :  { %v2682_v11 = vadd.f32 %v2681_v9, %v2680_v14  ;;  %v2574_v7 = vpop.f32.mrf.mxu0 }
 0x1f5   :  { %v2683_v15 = vpop.f32.mrf.mxu1 }
 0x1f6   :  { %v2575_v16 = vpop.f32.mrf.mxu0  ;;  %v4036_v0 = vadd.f32 %v2682_v11, %v2570_v57 }
 0x1f7   :  { %v2576_v49 = vadd.f32 %v2575_v16, %v2574_v7  ;;  %v2684_v13 = vpop.f32.mrf.mxu1 }
 0x1f8   :  { %v2685_v17 = vadd.f32 %v2684_v13, %v2683_v15  ;;  %v2577_v19 = vpop.f32.mrf.mxu0  ;;  %v4059_v13 = vpop.permute.xlu0 %1841 }
 0x1f9   :  { %v2686_v20 = vpop.f32.mrf.mxu1 }
 0x1fa   :  { %v2578_v22 = vpop.f32.mrf.mxu0  ;;  %v4038_v23 = vadd.f32 %v2685_v17, %v2573_v8 }
 0x1fb   :  { %v2579_v25 = vadd.f32 %v2578_v22, %v2577_v19  ;;  %v2687_v26 = vpop.f32.mrf.mxu1  ;;  %v4063_v22 = vpop.permute.xlu1 %1876 }
 0x1fc   :  { %v2688_v29 = vadd.f32 %v2687_v26, %v2686_v20  ;;  %v2580_v30 = vpop.f32.mrf.mxu0 }
 0x1fd   :  { %v2689_v31 = vpop.f32.mrf.mxu1 }
 0x1fe   :  { %v2581_v34 = vpop.f32.mrf.mxu0  ;;  %v4042_v3 = vadd.f32 %v2688_v29, %v2576_v49 }
 0x1ff   :  { %v2582_v56 = vadd.f32 %v2581_v34, %v2580_v30  ;;  %v2690_v35 = vpop.f32.mrf.mxu1 }
 0x200   :  { %v2691_v21 = vadd.f32 %v2690_v35, %v2689_v31  ;;  %v2583_v37 = vpop.f32.mrf.mxu0  ;;  %v4067_v35 = vpop.permute.xlu0 %1881 }
 0x201   :  { %v2692_v38 = vpop.f32.mrf.mxu1 }
 0x202   :  { %v2584_v41 = vpop.f32.mrf.mxu0  ;;  %v4046_v10 = vadd.f32 %v2691_v21, %v2579_v25 }
 0x203   :  { %v2585_v44 = vadd.f32 %v2584_v41, %v2583_v37  ;;  %v2693_v45 = vpop.f32.mrf.mxu1  ;;  %v1827_v41 = vpop.permute.xlu1 %1826 }
 0x204   :  { %4262 = vst [vmem:[#allocation10_spill] sm:$0xff] %v4046_v10  ;;  %v2694_v48 = vadd.f32 %v2693_v45, %v2692_v38  ;;  %v2586_v50 = vpop.f32.mrf.mxu0 }
 0x205   :  { %v2695_v52 = vpop.f32.mrf.mxu1 }
 0x206   :  { %v2587_v53 = vpop.f32.mrf.mxu0  ;;  %v4051_v5 = vadd.f32 %v2694_v48, %v2582_v56 }
 0x207   :  { %v2588_v4 = vadd.f32 %v2587_v53, %v2586_v50  ;;  %v2696_v57 = vpop.f32.mrf.mxu1 }
 0x208   :  { %v2697_v43 = vadd.f32 %v2696_v57, %v2695_v52  ;;  %v2589_v59 = vpop.f32.mrf.mxu0  ;;  %v1832_v57 = vpop.permute.xlu0 %1831 }
 0x209   :  { %v2698_v14 = vpop.f32.mrf.mxu1 }
 0x20a   :  { %v2590_v8 = vpop.f32.mrf.mxu0  ;;  %v4057_v9 = vadd.f32 %v2697_v43, %v2585_v44 }
 0x20b   :  { %v2591_v11 = vadd.f32 %v2590_v8, %v2589_v59  ;;  %v2699_v7 = vpop.f32.mrf.mxu1  ;;  %v4073_v8 = vpop.permute.xlu1 %1866 }
 0x20c   :  { %4263 = vst [vmem:[#allocation11_spill] sm:$0xff] %v4057_v9  ;;  %v2700_v15 = vadd.f32 %v2699_v7, %v2698_v14  ;;  %v2592_v16 = vpop.f32.mrf.mxu0 }
 0x20d   :  { %v2701_v49 = vpop.f32.mrf.mxu1 }
 0x20e   :  { %v2593_v17 = vpop.f32.mrf.mxu0  ;;  %v4061_v19 = vadd.f32 %v2700_v15, %v2588_v4 }
 0x20f   :  { %v2594_v20 = vadd.f32 %v2593_v17, %v2592_v16  ;;  %v2702_v25 = vpop.f32.mrf.mxu1 }
 0x210   :  { %4264 = vst [vmem:[#allocation12_spill] sm:$0xff] %v4061_v19  ;;  %v2703_v26 = vadd.f32 %v2702_v25, %v2701_v49  ;;  %v2595_v29 = vpop.f32.mrf.mxu0  ;;  %v4082_v25 = vpop.permute.xlu0 %1871 }
 0x211   :  { %v2704_v30 = vpop.f32.mrf.mxu1 }
 0x212   :  { %v2596_v31 = vpop.f32.mrf.mxu0  ;;  %v4065_v34 = vadd.f32 %v2703_v26, %v2591_v11 }
 0x213   :  { %v2597_v56 = vadd.f32 %v2596_v31, %v2595_v29  ;;  %v2705_v21 = vpop.f32.mrf.mxu1  ;;  %v1817_v31 = vpop.permute.xlu1 %1816 }
 0x214   :  { %4265 = vst [vmem:[#allocation13_spill] sm:$0xff] %v4065_v34  ;;  %v2706_v37 = vadd.f32 %v2705_v21, %v2704_v30  ;;  %v2598_v38 = vpop.f32.mrf.mxu0 }
 0x215   :  { %v2707_v44 = vpop.f32.mrf.mxu1 }
 0x216   :  { %v2599_v45 = vpop.f32.mrf.mxu0  ;;  %v4069_v48 = vadd.f32 %v2706_v37, %v2594_v20 }
 0x217   :  { %v2600_v50 = vadd.f32 %v2599_v45, %v2598_v38  ;;  %v2708_v52 = vpop.f32.mrf.mxu1  ;;  %v1822_v45 = vpop.permute.xlu0 %1821 }
 0x218   :  { %4266 = vst [vmem:[#allocation14_spill] sm:$0xff] %v4069_v48  ;;  %v2709_v53 = vadd.f32 %v2708_v52, %v2707_v44  ;;  %v2601_v4 = vpop.f32.mrf.mxu0 }
 0x219   :  { %v2710_v43 = vpop.f32.mrf.mxu1 }
 0x21a   :  { %v2602_v59 = vpop.f32.mrf.mxu0  ;;  %v4071_v14 = vadd.f32 %v2709_v53, %v2597_v56  ;;  %v4096_v53 = vpop.permute.xlu1 %1856 }
 0x21b   :  { %v2603_v11 = vadd.f32 %v2602_v59, %v2601_v4  ;;  %v2711_v7 = vpop.f32.mrf.mxu1 }
 0x21c   :  { %4267 = vst [vmem:[#allocation15_spill] sm:$0xff] %v4071_v14  ;;  %v2712_v15 = vadd.f32 %v2711_v7, %v2710_v43  ;;  %v4075_v16 = vpop.f32.mrf.mxu0 }
 0x21d   :  { %v2713_v49 = vpop.f32.mrf.mxu1 }
 0x21e   :  { %v4077_v17 = vpop.f32.mrf.mxu0  ;;  %v4079_v20 = vadd.f32 %v2712_v15, %v2600_v50 }
 0x21f   :  { %v2714_v26 = vpop.f32.mrf.mxu1 }
 0x220   :  { %4268 = vst [vmem:[#allocation16_spill] sm:$0xff] %v4079_v20  ;;  %v2715_v29 = vadd.f32 %v2714_v26, %v2713_v49  ;;  %v4084_v30 = vpop.f32.mrf.mxu0  ;;  %v4101_v49 = vpop.permute.xlu0 %1861 }
 0x221   :  { %v4086_v56 = vpop.f32.mrf.mxu1 }
 0x222   :  { %v4088_v21 = vpop.f32.mrf.mxu0  ;;  %v4090_v37 = vadd.f32 %v2715_v29, %v2603_v11 }
 0x223   :  { %v4092_v38 = vpop.f32.mrf.mxu1 }
 0x224   :  { %4269 = vst [vmem:[#allocation17_spill] sm:$0xff] %v4090_v37  ;;  %v2778_v44 = vpop.f32.mrf.mxu0  ;;  %v4104_v37 = vpop.permute.xlu1 %1926 }
 0x225   :  { %v4094_v50 = vpop.f32.mrf.mxu1  ;;  %v1370_v7 = vadd.f32 %v2778_v44, %v4004_v1  ;;  %4272 = vst [vmem:[#allocation20_spill] sm:$0xff] %v4104_v37  ;;  %v4108_v9 = vpop.permute.xlu0 %1931 }
 0x226   :  { %4270 = vst [vmem:[#allocation18_spill] sm:$0xff] %v4094_v50  ;;  %v1361_v52 = vpop.f32.mrf.mxu0 }
 0x227   :  { %v4098_v4 = vpop.f32.mrf.mxu1  ;;  %v1362_v11 = vadd.f32 %v1361_v52, %v4000_v61 }
 0x228   :  { %4271 = vst [vmem:[#allocation19_spill] sm:$0xff] %v4098_v4  ;;  %v2779_v43 = vpop.f32.mrf.mxu0 }
 0x229   :  { %v2820_v59 = vpop.f32.mrf.mxu1  ;;  %v1373_v20 = vadd.f32 %v2779_v43, %v4006_v24  ;;  %v4112_v24 = vpop.permute.xlu1 %1966 }
 0x22a   :  { %v1364_v15 = vpop.f32.mrf.mxu0  ;;  %v1664_v29 = vadd.f32 %v2820_v59, %v1370_v7 }
 0x22b   :  { %v1655_v26 = vpop.f32.mrf.mxu1  ;;  %v1365_v4 = vadd.f32 %v1364_v15, %v4002_v6 }
 0x22c   :  { %v2782_v51 = vpop.f32.mrf.mxu0  ;;  %v1656_v34 = vadd.f32 %v1655_v26, %v1362_v11  ;;  %v1976_v1 = vadd.f32 %v1827_v41, %v1664_v29 }
 0x22d   :  { %v2821_v10 = vpop.f32.mrf.mxu1  ;;  %v1386_v61 = vadd.f32 %v2782_v51, %v4012_v42  ;;  %v4115_v51 = vpop.permute.xlu0 %1971 }
 0x22e   :  { %v1377_v50 = vpop.f32.mrf.mxu0  ;;  %v1667_v14 = vadd.f32 %v2821_v10, %v1373_v20  ;;  %v1974_v48 = vadd.f32 %v1817_v31, %v1656_v34  ;;  %v2474_v6 = vmul.f32 -1.442695, %v1976_v1 }
 0x22f   :  { %v1658_v19 = vpop.f32.mrf.mxu1  ;;  %v1378_v7 = vadd.f32 %v1377_v50, %v4008_v32 }
 0x230   :  { %v2783_v44 = vpop.f32.mrf.mxu0  ;;  %v1659_v52 = vadd.f32 %v1658_v19, %v1365_v4  ;;  %v1977_v43 = vadd.f32 %v1832_v57, %v1667_v14  ;;  %v2472_v15 = vmul.f32 -1.442695, %v1974_v48  ;;  %3007 = vpow2.f32 %v2474_v6 }
 0x231   :  { %v2824_v59 = vpop.f32.mrf.mxu1  ;;  %v1389_v10 = vadd.f32 %v2783_v44, %v4014_v47  ;;  %v4120_v47 = vpop.permute.xlu1 %1916 }
 0x232   :  { %v1380_v37 = vpop.f32.mrf.mxu0  ;;  %v1680_v11 = vadd.f32 %v2824_v59, %v1386_v61  ;;  %v1975_v29 = vadd.f32 %v1822_v45, %v1659_v52  ;;  %v2475_v19 = vmul.f32 -1.442695, %v1977_v43  ;;  %3009 = vpow2.f32 %v2472_v15 }
 0x233   :  { %v1671_v26 = vpop.f32.mrf.mxu1 }
 0x234   :  { %v1672_v41 = vadd.f32 %v1671_v26, %v1378_v7  ;;  %v2786_v20 = vpop.f32.mrf.mxu0  ;;  %v1980_v32 = vadd.f32 %v4044_v39, %v1680_v11  ;;  %v2473_v48 = vmul.f32 -1.442695, %v1975_v29  ;;  %3011 = vpow2.f32 %v2475_v19  ;;  %v4126_v26 = vpop.permute.xlu0 %1921 }
 0x235   :  { %v2825_v34 = vpop.f32.mrf.mxu1  ;;  %v1402_v14 = vadd.f32 %v2786_v20, %v4020_v12  ;;  %v1381_v7 = vadd.f32 %v1380_v37, %v4010_v36  ;;  %v4131_v29 = vpop.permute.xlu1 %1956 }
 0x236   :  { %v1683_v31 = vadd.f32 %v2825_v34, %v1389_v10  ;;  %v1393_v42 = vpop.f32.mrf.mxu0  ;;  %v1978_v57 = vadd.f32 %v4055_v62, %v1672_v41  ;;  %v2478_v39 = vmul.f32 -1.442695, %v1980_v32  ;;  %3013 = vpow2.f32 %v2473_v48 }
 0x237   :  { %v1674_v50 = vpop.f32.mrf.mxu1  ;;  %v1394_v44 = vadd.f32 %v1393_v42, %v4016_v54 }
 0x238   :  { %v2787_v4 = vpop.f32.mrf.mxu0  ;;  %v1981_v45 = vadd.f32 %v4040_v33, %v1683_v31  ;;  %v2476_v62 = vmul.f32 -1.442695, %v1978_v57  ;;  %v1675_v54 = vadd.f32 %v1674_v50, %v1381_v7  ;;  %3015 = vpow2.f32 %v2478_v39 }
 0x239   :  { %v2828_v1 = vpop.f32.mrf.mxu1  ;;  %v1405_v33 = vadd.f32 %v2787_v4, %v4022_v18 }
 0x23a   :  { %v1696_v61 = vadd.f32 %v2828_v1, %v1402_v14  ;;  %v1396_v52 = vpop.f32.mrf.mxu0  ;;  %v2479_v6 = vmul.f32 -1.442695, %v1981_v45  ;;  %3017 = vpow2.f32 %v2476_v62  ;;  %v4137_v14 = vpop.permute.xlu0 %1961 }
 0x23b   :  { %v1687_v59 = vpop.f32.mrf.mxu1  ;;  %v1397_v41 = vadd.f32 %v1396_v52, %v4018_v60  ;;  %v1979_v60 = vadd.f32 %v4059_v13, %v1675_v54 }
 0x23c   :  { %v1984_v12 = vadd.f32 %v4073_v8, %v1696_v61  ;;  %v1688_v43 = vadd.f32 %v1687_v59, %v1394_v44  ;;  %v2790_v11 = vpop.f32.mrf.mxu0  ;;  %3019 = vpow2.f32 %v2479_v6  ;;  %v1907_v61 = vpop.permute.xlu1 %1906 }
 0x23d   :  { %v2829_v10 = vpop.f32.mrf.mxu1  ;;  %v1418_v34 = vadd.f32 %v2790_v11, %v4028_v40  ;;  %v2477_v59 = vmul.f32 -1.442695, %v1979_v60 }
 0x23e   :  { %v1982_v20 = vadd.f32 %v4096_v53, %v1688_v43  ;;  %v1409_v15 = vpop.f32.mrf.mxu0  ;;  %v2482_v36 = vmul.f32 -1.442695, %v1984_v12  ;;  %v1699_v8 = vadd.f32 %v2829_v10, %v1405_v33  ;;  %v1912_v10 = vpop.permute.xlu0 %1911 }
 0x23f   :  { %v1690_v37 = vpop.f32.mrf.mxu1  ;;  %v1410_v48 = vadd.f32 %v1409_v15, %v4024_v27 }
 0x240   :  { %v1691_v31 = vadd.f32 %v1690_v37, %v1397_v41  ;;  %v2791_v42 = vpop.f32.mrf.mxu0  ;;  %v2480_v18 = vmul.f32 -1.442695, %v1982_v20  ;;  %v1985_v19 = vadd.f32 %v4082_v25, %v1699_v8  ;;  %3021 = vpow2.f32 %v2482_v36  ;;  %v3008_v25 = vpop.eup %3007 }
 0x241   :  { %v2832_v32 = vpop.f32.mrf.mxu1  ;;  %v1421_v45 = vadd.f32 %v2791_v42, %v4030_v46  ;;  %v3010_v39 = vpop.eup %3009 }
 0x242   :  { %v1983_v53 = vadd.f32 %v4101_v49, %v1691_v31  ;;  %v1712_v50 = vadd.f32 %v2832_v32, %v1418_v34  ;;  %v1412_v57 = vpop.f32.mrf.mxu0  ;;  %v2483_v4 = vmul.f32 -1.442695, %v1985_v19  ;;  %3023 = vpow2.f32 %v2480_v18  ;;  %v3012_v11 = vpop.eup %3011 }
 0x243   :  { %v1703_v40 = vpop.f32.mrf.mxu1  ;;  %v1413_v27 = vadd.f32 %v1412_v57, %v4026_v2  ;;  %v2030_v33 = vadd.f32 1.0, %v3010_v39  ;;  %v3014_v20 = vpop.eup %3013  ;;  %v2033_v2 = vadd.f32 1.0, %v3012_v11 }
 0x244   :  { %v1988_v1 = vadd.f32 %v4049_v28, %v1712_v50  ;;  %v2794_v44 = vpop.f32.mrf.mxu0  ;;  %v2481_v13 = vmul.f32 -1.442695, %v1983_v53  ;;  %v1704_v52 = vadd.f32 %v1703_v40, %v1410_v48  ;;  %3025 = vpow2.f32 %v2483_v4  ;;  %v4146_v34 = vpop.permute.xlu1 %1946 }
 0x245   :  { %v2833_v49 = vpop.f32.mrf.mxu1  ;;  %v2032_v28 = vadd.f32 1.0, %v3008_v25  ;;  %v1434_v36 = vadd.f32 %v2794_v44, %v4036_v0  ;;  %v3016_v31 = vpop.eup %3015  ;;  %v2031_v60 = vadd.f32 1.0, %v3014_v20 }
 0x246   :  { %v1715_v7 = vadd.f32 %v2833_v49, %v1421_v45  ;;  %v1425_v62 = vpop.f32.mrf.mxu0  ;;  %v2486_v12 = vmul.f32 -1.442695, %v1988_v1  ;;  %v1986_v43 = vadd.f32 %v4063_v22, %v1704_v52  ;;  %3027 = vpow2.f32 %v2481_v13  ;;  %v4151_v45 = vpop.permute.xlu0 %1951 }
 0x247   :  { %v1706_v46 = vpop.f32.mrf.mxu1  ;;  %3029 = vpow2.f32 %v2477_v59  ;;  %v1426_v42 = vadd.f32 %v1425_v62, %v4032_v55  ;;  %v3018_v32 = vpop.eup %3017  ;;  %v2036_v40 = vadd.f32 1.0, %v3016_v31  ;;  %v2609_v31 = vadd.f32 %v4088_v21, %v4084_v30 }
 0x248   :  { %v2795_v6 = vpop.f32.mrf.mxu0  ;;  %v1707_v54 = vadd.f32 %v1706_v46, %v1413_v27  ;;  %v2484_v15 = vmul.f32 -1.442695, %v1986_v43  ;;  %v1989_v8 = vadd.f32 %v4053_v58, %v1715_v7  ;;  %3031 = vpow2.f32 %v2486_v12  ;;  %v1897_v39 = vpop.permute.xlu1 %1896 }
 0x249   :  { %v2836_v41 = vpop.f32.mrf.mxu1  ;;  %3033 = vrcp.f32 %v2032_v28  ;;  %v3020_v50 = vpop.eup %3019  ;;  %v1437_v57 = vadd.f32 %v2795_v6, %v4038_v23  ;;  %v2034_v44 = vadd.f32 1.0, %v3018_v32 }
 0x24a   :  { %v1428_v37 = vpop.f32.mrf.mxu0  ;;  %v1728_v18 = vadd.f32 %v2836_v41, %v1434_v36  ;;  %3035 = vrcp.f32 %v2030_v33  ;;  %v1987_v53 = vadd.f32 %v4067_v35, %v1707_v54  ;;  %v2487_v58 = vmul.f32 -1.442695, %v1989_v8  ;;  %v1902_v20 = vpop.permute.xlu0 %1901 }
 0x24b   :  { %v1719_v22 = vpop.f32.mrf.mxu1  ;;  %3037 = vpow2.f32 %v2484_v15  ;;  %v1429_v13 = vadd.f32 %v1428_v37, %v4034_v63  ;;  %v2037_v49 = vadd.f32 1.0, %v3020_v50  ;;  %v2718_v54 = vadd.f32 %v4092_v38, %v4086_v56  ;;  %v4275_v50 = vld [vmem:[#allocation11_spill] sm:$0xff] }
 0x24c   :  { %v2798_v19 = vpop.f32.mrf.mxu0  ;;  %v1720_v4 = vadd.f32 %v1719_v22, %v1426_v42  ;;  %3039 = vrcp.f32 %v2033_v2  ;;  %v1992_v25 = vadd.f32 %v1907_v61, %v1728_v18  ;;  %v2485_v59 = vmul.f32 -1.442695, %v1987_v53 }
 0x24d   :  { %v2837_v0 = vpop.f32.mrf.mxu1  ;;  %v3022_v1 = vpop.eup %3021  ;;  %3041 = vrcp.f32 %v2031_v60  ;;  %v1450_v12 = vadd.f32 %v2798_v19, %v4051_v5  ;;  %v2606_v8 = vadd.f32 %v4077_v17, %v4075_v16  ;;  %v4273_v19 = vld [vmem:[#allocation20_spill] sm:$0xff]  ;;  %v4274_v60 = vld [vmem:[#allocation14_spill] sm:$0xff] }
 0x24e   :  { %v1441_v48 = vpop.f32.mrf.mxu0  ;;  %v1731_v52 = vadd.f32 %v2837_v0, %v1437_v57  ;;  %3043 = vpow2.f32 %v2487_v58  ;;  %v1990_v62 = vadd.f32 %v1897_v39, %v1720_v4  ;;  %v2080_v46 = vadd.f32 1.0, %v3022_v1 }
 0x24f   :  { %v1722_v55 = vpop.f32.mrf.mxu1  ;;  %v3024_v23 = vpop.eup %3023  ;;  %3045 = vrcp.f32 %v2036_v40  ;;  %v2490_v63 = vmul.f32 -1.442695, %v1992_v25  ;;  %v1442_v15 = vadd.f32 %v1441_v48, %v4042_v3  ;;  %v1321_v30 = vadd.f32 %v2718_v54, %v2606_v8  ;;  %v4276_v48 = vld [vmem:[#allocation12_spill] sm:$0xff]  ;;  %v4281_v54 = vld [vmem:[#allocation13_spill] sm:$0xff] }
 0x250   :  { %v2799_v35 = vpop.f32.mrf.mxu0  ;;  %v1723_v27 = vadd.f32 %v1722_v55, %v1429_v13  ;;  %3047 = vrcp.f32 %v2034_v44  ;;  %v1993_v28 = vadd.f32 %v1912_v10, %v1731_v52  ;;  %v2078_v41 = vadd.f32 1.0, %v3024_v23 }
 0x251   :  { %v2840_v7 = vpop.f32.mrf.mxu1  ;;  %v3026_v61 = vpop.eup %3025  ;;  %3049 = vrcp.f32 %v2037_v49  ;;  %v2488_v37 = vmul.f32 -1.442695, %v1990_v62  ;;  %v1453_v58 = vadd.f32 %v2799_v35, %v4275_v50 }
 0x252   :  { %v1444_v43 = vpop.f32.mrf.mxu0  ;;  %v1744_v6 = vadd.f32 %v2840_v7, %v1450_v12  ;;  %3051 = vpow2.f32 %v2485_v59  ;;  %v1991_v2 = vadd.f32 %v1902_v20, %v1723_v27  ;;  %v2081_v56 = vadd.f32 1.0, %v3026_v61  ;;  %v4277_v59 = vld [vmem:[#allocation15_spill] sm:$0xff]  ;;  %v4278_v12 = vld [vmem:[#allocation18_spill] sm:$0xff] }
 0x253   :  { %v1735_v11 = vpop.f32.mrf.mxu1  ;;  %v3028_v36 = vpop.eup %3027  ;;  %3053 = vrcp.f32 %v2080_v46  ;;  %v2491_v3 = vmul.f32 -1.442695, %v1993_v28  ;;  %v4279_v27 = vld [vmem:[#allocation19_spill] sm:$0xff] }
 0x254   :  { %v2802_v33 = vpop.f32.mrf.mxu0  ;;  %v4160_v10 = vpop.eup %3029  ;;  %v1736_v38 = vadd.f32 %v1735_v11, %v1442_v15  ;;  %3055 = vpow2.f32 %v2490_v63  ;;  %v1996_v32 = vadd.f32 %v4273_v19, %v1744_v6  ;;  %v2079_v0 = vadd.f32 1.0, %v3028_v36  ;;  %v4280_v11 = vld [vmem:[#allocation10_spill] sm:$0xff] }
 0x255   :  { %v2841_v5 = vpop.f32.mrf.mxu1  ;;  %v3032_v18 = vpop.eup %3031  ;;  %v1466_v16 = vadd.f32 %v2802_v33, %v4274_v60  ;;  %3057 = vrcp.f32 %v2078_v41  ;;  %v2489_v4 = vmul.f32 -1.442695, %v1991_v2  ;;  %v2721_v46 = vadd.f32 %v4279_v27, %v4278_v12 }
 0x256   :  { %v1457_v22 = vpop.f32.mrf.mxu0  ;;  %v4166_v53 = vpop.eup %3033  ;;  %3059 = vpow2.f32 %v2488_v37  ;;  %v2084_v25 = vadd.f32 1.0, %v3032_v18  ;;  %v1994_v13 = vadd.f32 %v4120_v47, %v1736_v38  ;;  %v1747_v52 = vadd.f32 %v2841_v5, %v1453_v58 }
 0x257   :  { %v1738_v42 = vpop.f32.mrf.mxu1  ;;  %v4169_v21 = vpop.eup %3035  ;;  %v1458_v40 = vadd.f32 %v1457_v22, %v4276_v48  ;;  %3061 = vrcp.f32 %v2081_v56  ;;  %v2494_v35 = vmul.f32 -1.442695, %v1996_v32  ;;  %v1445_v61 = vadd.f32 %v1444_v43, %v4280_v11 }
 0x258   :  { %v2803_v17 = vpop.f32.mrf.mxu0  ;;  %v3038_v44 = vpop.eup %3037  ;;  %3063 = vpow2.f32 %v2491_v3  ;;  %v2492_v36 = vmul.f32 -1.442695, %v1994_v13  ;;  %v1997_v8 = vadd.f32 %v4108_v9, %v1747_v52  ;;  %v1324_v19 = vadd.f32 %v2721_v46, %v2609_v31  ;;  %v4283_v52 = vld [vmem:[#allocation17_spill] sm:$0xff] }
 0x259   :  { %v2844_v57 = vpop.f32.mrf.mxu1  ;;  %v4173_v39 = vpop.eup %3039  ;;  %v1469_v7 = vadd.f32 %v2803_v17, %v4277_v59  ;;  %3065 = vrcp.f32 %v2079_v0  ;;  %v2082_v33 = vadd.f32 1.0, %v3038_v44  ;;  %v4282_v17 = vld [vmem:[#allocation16_spill] sm:$0xff]  ;;  %v2035_v11 = vadd.f32 1.0, %v4160_v10 }
 0x25a   :  { %v1760_v55 = vadd.f32 %v2844_v57, %v1466_v16  ;;  %v1460_v1 = vpop.f32.mrf.mxu0  ;;  %v4180_v47 = vpop.eup %3041  ;;  %3067 = vpow2.f32 %v2489_v4 }
 0x25b   :  { %v1751_v49 = vpop.f32.mrf.mxu1  ;;  %v1937_v6 = vpop.permute.xlu1 %1936  ;;  %v1461_v41 = vadd.f32 %v1460_v1, %v4281_v54  ;;  %3069 = vrcp.f32 %v2084_v25 }
 0x25c   :  { %v1752_v23 = vadd.f32 %v1751_v49, %v1458_v40  ;;  %v2806_v62 = vpop.f32.mrf.mxu0  ;;  %v2000_v63 = vadd.f32 %v4146_v34, %v1760_v55  ;;  %v3044_v5 = vpop.eup %3043  ;;  %3071 = vpow2.f32 %v2494_v35  ;;  %v1739_v34 = vadd.f32 %v1738_v42, %v1445_v61 }
 0x25d   :  { %v2845_v28 = vpop.f32.mrf.mxu1  ;;  %v4184_v43 = vpop.eup %3045  ;;  %v1482_v22 = vadd.f32 %v2806_v62, %v1321_v30  ;;  %v2085_v9 = vadd.f32 1.0, %v3044_v5  ;;  %v2495_v42 = vmul.f32 -1.442695, %v1997_v8  ;;  %v61_v5 = vld [vmem:[%s4250_s2 + $0x18] sm:$0xff] }
 0x25e   :  { %v1763_v20 = vadd.f32 %v2845_v28, %v1469_v7  ;;  %v1473_v15 = vpop.f32.mrf.mxu0  ;;  %v1998_v37 = vadd.f32 %v1937_v6, %v1752_v23  ;;  %v4186_v18 = vpop.eup %3047  ;;  %3073 = vtanh.f32 %v2000_v63 }
 0x25f   :  { %v1754_v2 = vpop.f32.mrf.mxu1  ;;  %v4189_v60 = vpop.eup %3049  ;;  %3075 = vrcp.f32 %v2082_v33  ;;  %v1474_v0 = vadd.f32 %v1473_v15, %v4282_v17 }
 0x260   :  { %v1755_v56 = vadd.f32 %v1754_v2, %v1461_v41  ;;  %v2807_v38 = vpop.f32.mrf.mxu0  ;;  %v2001_v3 = vadd.f32 %v4151_v45, %v1763_v20  ;;  %v1942_v16 = vpop.permute.xlu0 %1941  ;;  %3077 = vtanh.f32 %v1998_v37  ;;  %v1995_v45 = vadd.f32 %v4126_v26, %v1739_v34 }
 0x261   :  { %v2848_v32 = vpop.f32.mrf.mxu1  ;;  %v3052_v58 = vpop.eup %3051  ;;  %3079 = vpow2.f32 %v2492_v36  ;;  %v1485_v31 = vadd.f32 %v2807_v38, %v1324_v19 }
 0x262   :  { %v1776_v50 = vadd.f32 %v2848_v32, %v1482_v22  ;;  %v1999_v57 = vadd.f32 %v1942_v16, %v1755_v56  ;;  %v1476_v30 = vpop.f32.mrf.mxu0  ;;  %v3054_v48 = vpop.eup %3053  ;;  %3081 = vtanh.f32 %v2001_v3  ;;  %v2083_v13 = vadd.f32 1.0, %v3052_v58  ;;  %v59_v56 = vld [vmem:[%s4250_s2 + $0x8] sm:$0xff] }
 0x263   :  { %v1767_v4 = vpop.f32.mrf.mxu1  ;;  %v3056_v55 = vpop.eup %3055  ;;  %3083 = vrcp.f32 %v2085_v9  ;;  %v1477_v49 = vadd.f32 %v1476_v30, %v4283_v52  ;;  %v2493_v26 = vmul.f32 -1.442695, %v1995_v45 }
 0x264   :  { %v1768_v40 = vadd.f32 %v1767_v4, %v1474_v0  ;;  %v2004_v1 = vadd.f32 %v4112_v24, %v1776_v50  ;;  %v3058_v25 = vpop.eup %3057  ;;  %3085 = vtanh.f32 %v1999_v57  ;;  %v2128_v54 = vadd.f32 1.0, %v3056_v55 }
 0x265   :  { %v2849_v44 = vpop.f32.mrf.mxu1  ;;  %v3060_v59 = vpop.eup %3059  ;;  %3087 = vpow2.f32 %v2495_v42 }
 0x266   :  { %v1779_v35 = vadd.f32 %v2849_v44, %v1485_v31  ;;  %v2002_v7 = vadd.f32 %v4131_v29, %v1768_v40  ;;  %v3062_v62 = vpop.eup %3061  ;;  %3089 = vtanh.f32 %v2004_v1  ;;  %v60_v29 = vld [vmem:[%s4250_s2 + $0x10] sm:$0xff]  ;;  %v2126_v15 = vadd.f32 1.0, %v3060_v59 }
 0x267   :  { %v1770_v23 = vpop.f32.mrf.mxu1  ;;  %v3064_v27 = vpop.eup %3063  ;;  %3091 = vrcp.f32 %v2083_v13  ;;  %v2160_v41 = vmul.f32 %v3054_v48, %v60_v29  ;;  %v2161_v3 = vmul.f32 %v3062_v62, %v61_v5 }
 0x268   :  { %v1771_v12 = vadd.f32 %v1770_v23, %v1477_v49  ;;  %v2005_v24 = vadd.f32 %v4115_v51, %v1779_v35  ;;  %v3066_v46 = vpop.eup %3065  ;;  %3093 = vtanh.f32 %v2002_v7  ;;  %v58_v51 = vld [vmem:[%s4250_s2] sm:$0xff]  ;;  %v2129_v22 = vadd.f32 1.0, %v3064_v27 }
 0x269   :  { %v3068_v61 = vpop.eup %3067  ;;  %3095 = vpow2.f32 %v2493_v26  ;;  %v2158_v37 = vmul.f32 %v3058_v25, %v58_v51  ;;  %v2159_v0 = vmul.f32 %v3066_v46, %v59_v56 }
 0x26a   :  { %v2003_v63 = vadd.f32 %v4137_v14, %v1771_v12  ;;  %v3070_v28 = vpop.eup %3069  ;;  %3097 = vtanh.f32 %v2005_v24  ;;  %v2127_v16 = vadd.f32 1.0, %v3068_v61 }
 0x26b   :  { %v3072_v6 = vpop.eup %3071  ;;  %3099 = vrcp.f32 %v2035_v11 }
 0x26c   :  { %v3074_v33 = vpop.eup %3073  ;;  %3101 = vtanh.f32 %v2003_v63  ;;  %v2132_v42 = vadd.f32 1.0, %v3072_v6 }
 0x26d   :  { %v3076_v10 = vpop.eup %3075  ;;  %v2168_v20 = vmul.f32 %v3074_v33, %v4166_v53  ;;  %3103 = vrcp.f32 %v2128_v54 }
 0x26e   :  { %v3078_v14 = vpop.eup %3077 }
 0x26f   :  { %v3080_v36 = vpop.eup %3079  ;;  %v2176_v8 = vadd.f32 %v2168_v20, %v2160_v41  ;;  %v2166_v2 = vmul.f32 %v3078_v14, %v4169_v21  ;;  %v64_v21 = vld [vmem:[%s4250_s2 + $0x30] sm:$0xff] }
 0x270   :  { %v3082_v34 = vpop.eup %3081  ;;  %v2164_v4 = vmul.f32 %v3070_v28, %v64_v21  ;;  %v2130_v31 = vadd.f32 1.0, %v3080_v36 }
 0x271   :  { %v3084_v53 = vpop.eup %3083  ;;  %3105 = vtanh.f32 %v2176_v8  ;;  %2224 = vst [vmem:[#allocation6 + $0x10] sm:$0xff] %v2176_v8  ;;  %v2174_v38 = vadd.f32 %v2166_v2, %v2158_v37  ;;  %v2169_v19 = vmul.f32 %v3082_v34, %v4173_v39  ;;  %v62_v39 = vld [vmem:[%s4250_s2 + $0x20] sm:$0xff] }
 0x272   :  { %v3086_v32 = vpop.eup %3085  ;;  %3107 = vrcp.f32 %v2126_v15  ;;  %v2162_v1 = vmul.f32 %v3076_v10, %v62_v39 }
 0x273   :  { %v3088_v9 = vpop.eup %3087  ;;  %3109 = vtanh.f32 %v2174_v38  ;;  %2222 = vst [vmem:[#allocation6] sm:$0xff] %v2174_v38  ;;  %v2177_v17 = vadd.f32 %v2169_v19, %v2161_v3  ;;  %v2167_v50 = vmul.f32 %v3086_v32, %v4180_v47  ;;  %v65_v47 = vld [vmem:[%s4250_s2 + $0x38] sm:$0xff]  ;;  %v4284_v3 = vmov 0.0   ;;  %v2230_v19 = vld [vmem:[%s4255_s7] sm:$0x3] }
 0x274   :  { %v3090_v58 = vpop.eup %3089  ;;  %3111 = vrcp.f32 %v2129_v22  ;;  %v2133_v13 = vadd.f32 1.0, %v3088_v9  ;;  %v2165_v35 = vmul.f32 %v3084_v53, %v65_v47 }
 0x275   :  { %v3092_v57 = vpop.eup %3091  ;;  %3113 = vtanh.f32 %v2177_v17  ;;  %2225 = vst [vmem:[#allocation6 + $0x18] sm:$0xff] %v2177_v17  ;;  %v2175_v30 = vadd.f32 %v2167_v50, %v2159_v0  ;;  %v2172_v48 = vmul.f32 %v3090_v58, %v4184_v43  ;;  %v63_v43 = vld [vmem:[%s4250_s2 + $0x28] sm:$0xff] }
 0x276   :  { %v3094_v45 = vpop.eup %3093  ;;  %3115 = vrcp.f32 %v2127_v16  ;;  %v2163_v62 = vmul.f32 %v3092_v57, %v63_v43 }
 0x277   :  { %v3096_v40 = vpop.eup %3095  ;;  %3117 = vtanh.f32 %v2175_v30  ;;  %2223 = vst [vmem:[#allocation6 + $0x8] sm:$0xff] %v2175_v30  ;;  %v2180_v55 = vadd.f32 %v2172_v48, %v2164_v4  ;;  %v2170_v44 = vmul.f32 %v3094_v45, %v4186_v18 }
 0x278   :  { %v3098_v25 = vpop.eup %3097  ;;  %3119 = vrcp.f32 %v2132_v42  ;;  %v2131_v23 = vadd.f32 1.0, %v3096_v40 }
 0x279   :  { %v3100_v52 = vpop.eup %3099  ;;  %3121 = vtanh.f32 %v2180_v55  ;;  %2228 = vst [vmem:[#allocation6 + $0x30] sm:$0xff] %v2180_v55  ;;  %v2178_v49 = vadd.f32 %v2170_v44, %v2162_v1  ;;  %v2173_v59 = vmul.f32 %v3098_v25, %v4189_v60 }
 0x27a   :  { %v3102_v7 = vpop.eup %3101  ;;  %3123 = vrcp.f32 %v2130_v31 }
 0x27b   :  { %3125 = vtanh.f32 %v2178_v49  ;;  %2226 = vst [vmem:[#allocation6 + $0x20] sm:$0xff] %v2178_v49  ;;  %v2181_v18 = vadd.f32 %v2173_v59, %v2165_v35  ;;  %v2171_v26 = vmul.f32 %v3102_v7, %v3100_v52  ;;  %v3104_v12 = vpop.eup %3103 }
 0x27c   :  { %3127 = vrcp.f32 %v2133_v13 }
 0x27d   :  { %3129 = vtanh.f32 %v2181_v18  ;;  %2229 = vst [vmem:[#allocation6 + $0x38] sm:$0xff] %v2181_v18  ;;  %v2179_v27 = vadd.f32 %v2171_v26, %v2163_v62 }
 0x27e   :  { %v3106_v24 = vpop.eup %3105  ;;  %3131 = vrcp.f32 %v2131_v23 }
 0x27f   :  { %v3108_v46 = vpop.eup %3107  ;;  %3133 = vtanh.f32 %v2179_v27  ;;  %2227 = vst [vmem:[#allocation6 + $0x28] sm:$0xff] %v2179_v27  ;;  %v2192_v11 = vmul.f32 %v3106_v24, %v3104_v12 }
 0x280   :  { %v3110_v60 = vpop.eup %3109 }
 0x281   :  { %v3112_v61 = vpop.eup %3111  ;;  %2216 = vst [vmem:[#allocation4 + $0x10] sm:$0xff] %v2192_v11  ;;  %v2190_v63 = vmul.f32 %v3110_v60, %v3108_v46 }
 0x282   :  { %v3114_v28 = vpop.eup %3113 }
 0x283   :  { %v3116_v29 = vpop.eup %3115  ;;  %v2193_v6 = vmul.f32 %v3114_v28, %v3112_v61  ;;  %2214 = vst [vmem:[#allocation4] sm:$0xff] %v2190_v63 }
 0x284   :  { %v3118_v33 = vpop.eup %3117 }
 0x285   :  { %v3120_v54 = vpop.eup %3119  ;;  %2217 = vst [vmem:[#allocation4 + $0x18] sm:$0xff] %v2193_v6  ;;  %v2232_v51 = vpack.c.bf16 %v2193_v6, %v2192_v11  ;;  %v2191_v10 = vmul.f32 %v3118_v33, %v3116_v29 }
 0x286   :  { %v3122_v41 = vpop.eup %3121 }
 0x287   :  { %v3124_v20 = vpop.eup %3123  ;;  %v2196_v14 = vmul.f32 %v3122_v41, %v3120_v54  ;;  %2215 = vst [vmem:[#allocation4 + $0x8] sm:$0xff] %v2191_v10  ;;  %v2231_v15 = vpack.c.bf16 %v2191_v10, %v2190_v63 }
 0x288   :  { %v3126_v5 = vpop.eup %3125 }
 0x289   :  { %v3128_v36 = vpop.eup %3127  ;;  %2220 = vst [vmem:[#allocation4 + $0x30] sm:$0xff] %v2196_v14  ;;  %v2194_v8 = vmul.f32 %v3126_v5, %v3124_v20 }
 0x28a   :  { %v3130_v37 = vpop.eup %3129 }
 0x28b   :  { %v3132_v2 = vpop.eup %3131  ;;  %v2197_v34 = vmul.f32 %v3130_v37, %v3128_v36  ;;  %2218 = vst [vmem:[#allocation4 + $0x20] sm:$0xff] %v2194_v8 }
 0x28c   :  { %v3134_v22 = vpop.eup %3133 }
 0x28d   :  { %2221 = vst [vmem:[#allocation4 + $0x38] sm:$0xff] %v2197_v34  ;;  %v2234_v56 = vpack.c.bf16 %v2197_v34, %v2196_v14  ;;  %v2195_v53 = vmul.f32 %v3134_v22, %v3132_v2 }
 0x28f   :  { %2851 = vmatpush3.bf16.msra.mxu0 %v2234_v56  ;;  %2219 = vst [vmem:[#allocation4 + $0x28] sm:$0xff] %v2195_v53  ;;  %v2233_v38 = vpack.c.bf16 %v2195_v53, %v2194_v8 }
 0x290   :  { %2852 = vmatprep.subr.bf16.mxu0 %v4284_v3 }
 0x293   :  { %2853 = vmatpush3.bf16.msra.mxu0 %v2233_v38 }
 0x294   :  { %2854 = vmatprep.subr.bf16.mxu0 %v4284_v3 }
 0x297   :  { %2855 = vmatpush3.bf16.msra.mxu0 %v2232_v51 }
 0x298   :  { %2856 = vmatprep.subr.bf16.mxu0 %v4284_v3 }
 0x29b   :  { %2857 = vmatpush3.bf16.msra.mxu0 %v2231_v15 }
 0x29e   :  { %2859 = vmatmul.mubr.msk.bf16.vlgmr.msra.gmra.mxu0 %vm956_vm1, %v2230_v19 }
 0x29f   :  { %3150 = shalt.err (!%p3147_p4)
}
 0x2a0   :  { %s3196_s23 = smov 128   ;;  %s3159_s7 = scalar_lea.vmem %s2311_s21, 1024 }
 0x2a1   :  { %2304 = dma.vmem_to_hbm [thread:$0]  %s2299_s3, 1024, %s4258_s10, [#allocation5], %s3196_s23, %s3196_s23, %s3183_s19  }
 0x2a2   :  { %p3160_p5 = scmp.ne.s32.totalorder %s2311_s21, %s3159_s7  ;;  %p3164_p6 = scmp.lt.s32.totalorder %s2311_s21, %s2311_s21 }
 0x2a3   :  { %p3165_p7 = scmp.lt.s32.totalorder %s3159_s7, %s3159_s7 }
 0x2a5   :  { %p3166_p8 = por %p3165_p7, %p3164_p6 }
 0x2a7   :  { %p3167_p9 = pnand %p3166_p8, %p3160_p5 }
 0x2a9   :  { %3170 = shalt.err (!%p3167_p9)
}
 0x2aa   :  { %2316 = dma.vmem_to_hbm [thread:$0]  %s2311_s21, 1024, %s4259_s11, [#allocation7], %s3196_s23, %s3196_s23, %s3183_s19   ;;  %v2239_v32 = vpop.permute.xlu1 %2238 }
 0x35e   :  { %v2278_v16 = vpop.f32.mrf.mxu0 }
 0x35f   :  { %v2279_v21 = vadd.f32 %v2278_v16, %v2239_v32 }
 0x360   :  { %v2860_v9 = vpop.f32.mrf.mxu0 }
 0x361   :  { %v2497_v17 = vmul.f32 -1.442695, %v2279_v21 }
 0x362   :  { %v2281_v0 = vpop.f32.mrf.mxu0 }
 0x363   :  { %3135 = vpow2.f32 %v2497_v17 }
 0x364   :  { %v2861_v50 = vpop.f32.mrf.mxu0 }
 0x370   :  { %v3136_v58 = vpop.eup %3135 }
 0x371   :  { %v2287_v42 = vadd.f32 1.0, %v3136_v58 }
 0x373   :  { %3137 = vrcp.f32 %v2287_v42 }
 0x380   :  { %v3138_v39 = vpop.eup %3137 }
 0x381   :  { %2290 = vst [vmem:[%s4257_s9] sm:$0x7] %v3138_v39 }
 0x382   :  { %3179 = dma.done.wait [#allocation5], 1024  }
 0x383   :  { %3180 = vsyncadd [#allocation5], 4294966272 }
 0x384   :  { %3181 = dma.done.wait [#allocation7], 1024  }
 0x385   :  { %3182 = vsyncadd [#allocation7], 4294966272 }
 0x386   :  { %2325 = vsyncpa [#allocation5], 1 }
 0x387   :  { %2326 = vsyncpa [#allocation7], 1 }

</bundles_post_ra>
